<compile_context>
chip_gen: v7x
topology: tpu7x:2x2x1
jax: 0.10.0
libtpu: 0.0.40
codegen_flags: <defaults>
</compile_context>

<pallas_src>
import functools

import jax
import jax.numpy as jnp
from jax import lax
from jax.experimental import pallas as pl
from jax.experimental.pallas import tpu as pltpu

EPS = 1e-5
LANE = 128      # lane width: pad Cout to a multiple of this (lane-dense stores / MXU N)
SUBLANE = 16    # bf16 sublane packing granule: M tiles are multiples of this


# ---------------------------------------------------------------------------
# small helpers
# ---------------------------------------------------------------------------

def _round_up(x, d):
    return (x + d - 1) // d * d


def _pad_rows(a, rows):
    return a if a.shape[0] == rows else jnp.pad(a, ((0, rows - a.shape[0]), (0, 0)))


def _pad_cols(a, cols):
    return a if a.shape[1] == cols else jnp.pad(a, ((0, 0), (0, cols - a.shape[1])))


def _mosaic_params(block_bytes, extra_bytes=0):
    """Derived VMEM budget: double-buffered pipeline blocks + in-kernel temporaries
    + headroom for compiler scratch.  Clamp to [32 MiB, 56 MiB] (v7x-safe) but never
    below what the blocks genuinely need."""
    need = 2 * block_bytes + extra_bytes + (4 << 20)
    limit = min(max(need, 32 << 20), 56 << 20)
    limit = max(limit, need)
    return pltpu.CompilerParams(
        dimension_semantics=("parallel",),   # independent tiles -> megacore on v7x
        vmem_limit_bytes=int(limit),
    )


def _pick_rows_tile(mpad, tm, cpad, out_itemsize, cap_rows=4096, cap_bytes=16 << 20):
    """Largest BN/ReLU row tile that divides mpad, keeps >=2 grid steps when possible
    and stays in a modest VMEM budget (the pass is pure HBM streaming)."""
    nt = mpad // tm
    best = tm
    for f in range(1, nt + 1):
        if nt % f:
            continue
        tb = tm * f
        if tb > cap_rows or 2 * tb * cpad * (2 + out_itemsize) > cap_bytes:
            break
        if f > 1 and nt // f < 2:
            continue
        best = tb
    return best


# ---------------------------------------------------------------------------
# Pallas kernels
# ---------------------------------------------------------------------------

def _write_stats(y, mask, st_ref):
    """Per-tile BN partials from the f32 accumulator (exact, before any bf16 cast):
    row 0 = masked per-channel sum, row 1 = sum of squared deviations about the
    tile's own masked mean (Welford/Chan-style, no catastrophic cancellation)."""
    ym = y * mask
    s = jnp.sum(ym, axis=0, keepdims=True)                 # (1, C)
    n = jnp.maximum(jnp.sum(mask), 1.0)
    mu = s / n
    d = (y - mu) * mask
    q = jnp.sum(d * d, axis=0, keepdims=True)              # (1, C)
    rows = lax.broadcasted_iota(jnp.int32, st_ref.shape, 0)
    st_ref[...] = jnp.where(rows == 0, s, jnp.where(rows == 1, q, 0.0))


def _mm_stats_kernel(p_ref, w_ref, mask_ref, y_ref, st_ref):
    # conv1 as an im2col matmul tile: bf16 x bf16 -> f32 MXU accumulation.
    y = jnp.dot(p_ref[...], w_ref[...], preferred_element_type=jnp.float32)
    y_ref[...] = y.astype(y_ref.dtype)                     # bf16 store (stats stay f32-exact)
    _write_stats(y, mask_ref[...], st_ref)


def _conv2_shift_acc(x_ref, w_ref, K, cpad, wp, lw):
    """Implicit-GEMM conv2: the padded image is a flat (L, C) buffer; each (ki, kj)
    tap is a contiguous row-slice starting at ki*Wp+kj, fed straight to the MXU."""
    acc = None
    for q in range(K * K):                                 # unrolled, static offsets
        ki, kj = divmod(q, K)
        base = ki * wp + kj
        xq = x_ref[0, pl.ds(base, lw), :]                  # (lw, cpad) bf16
        wq = w_ref[pl.ds(q * cpad, cpad), :]               # (cpad, cpad) bf16, resident
        d = jnp.dot(xq, wq, preferred_element_type=jnp.float32)
        acc = d if acc is None else acc + d
    return acc                                             # (lw, cpad) f32


def _conv2_proj_kernel(x_ref, w_ref, cm_ref, xs_ref, wp_ref, y_ref, st_ref, *,
                       K, cpad, wp, lw):
    acc = _conv2_shift_acc(x_ref, w_ref, K, cpad, wp, lw)
    # Fused 1x1 projection residual: separate small dot, no HBM concat copy.
    acc = acc + jnp.dot(xs_ref[0], wp_ref[...], preferred_element_type=jnp.float32)
    mask = cm_ref[...]
    y_ref[0] = (acc * mask).astype(y_ref.dtype)            # bf16 wide tile (masked cols = 0)
    _write_stats(acc, mask, st_ref)


def _conv2_ident_kernel(x_ref, w_ref, cm_ref, xs_ref, y_ref, st_ref, *,
                        K, cpad, wp, lw):
    acc = _conv2_shift_acc(x_ref, w_ref, K, cpad, wp, lw)
    acc = acc + xs_ref[0].astype(jnp.float32)              # bf16 residual widened in-kernel
    mask = cm_ref[...]
    y_ref[0] = (acc * mask).astype(y_ref.dtype)
    _write_stats(acc, mask, st_ref)


def _bn_relu_kernel(y_ref, sc_ref, sh_ref, o_ref):
    # Folded BatchNorm affine (scale/shift) + ReLU; f32 math, cast on store.
    z = y_ref[...].astype(jnp.float32) * sc_ref[...] + sh_ref[...]
    o_ref[...] = jnp.maximum(z, 0.0).astype(o_ref.dtype)


# ---------------------------------------------------------------------------
# pallas_call wrappers
# ---------------------------------------------------------------------------

def _matmul_stats(p, w, rmask, *, tm):
    """Tiled (Mpad, K) @ (K, Cpad) -> bf16 y plus per-tile BN partials."""
    mpad, kdim = p.shape
    cpad = w.shape[1]
    nt = mpad // tm
    # TODO(synk): add a K (contraction) grid axis + f32 VMEM accumulator and
    # pl.Buffered(1) on the weight spec for very large channel counts on v7x.
    block_bytes = (tm * kdim * 2 + kdim * cpad * 2 + tm * 4
                   + tm * cpad * 2 + 8 * cpad * 4)
    cost = pl.CostEstimate(
        flops=int(2 * mpad * kdim * cpad), transcendentals=0,
        bytes_accessed=int(p.size * 2 + w.size * 2 + mpad * 4
                           + mpad * cpad * 2 + nt * 8 * cpad * 4))
    return pl.pallas_call(
        _mm_stats_kernel,
        out_shape=(jax.ShapeDtypeStruct((mpad, cpad), jnp.bfloat16),
                   jax.ShapeDtypeStruct((nt * 8, cpad), jnp.float32)),
        grid=(nt,),
        in_specs=[pl.BlockSpec((tm, kdim), lambda i: (i, 0)),
                  pl.BlockSpec((kdim, cpad), lambda i: (0, 0)),   # weights resident
                  pl.BlockSpec((tm, 1), lambda i: (i, 0))],       # valid-row mask
        out_specs=(pl.BlockSpec((tm, cpad), lambda i: (i, 0)),
                   pl.BlockSpec((8, cpad), lambda i: (i, 0))),
        compiler_params=_mosaic_params(block_bytes),
        cost_estimate=cost,
    )(p, w, rmask)


def _conv2_res_stats(x2, w2flat, cmask, res, wproj, *, K, wp, lw, cpad):
    """Fused conv2 + residual + BN-partials, one spatially-padded image per grid step."""
    n, L, _ = x2.shape
    rc = res.shape[-1]
    kk = K * K
    if wproj is not None:
        kern = functools.partial(_conv2_proj_kernel, K=K, cpad=cpad, wp=wp, lw=lw)
        extra_specs = [pl.BlockSpec((rc, cpad), lambda i: (0, 0))]
        extra_args = [wproj]
        res_flops = 2 * n * lw * rc * cpad
        res_bytes = rc * cpad * 2
    else:
        kern = functools.partial(_conv2_ident_kernel, K=K, cpad=cpad, wp=wp, lw=lw)
        extra_specs, extra_args = [], []
        res_flops = n * lw * cpad
        res_bytes = 0
    block_bytes = (L * cpad * 2 + kk * cpad * cpad * 2 + lw * 4 + lw * rc * 2
                   + res_bytes + lw * cpad * 2 + 8 * cpad * 4)
    acc_bytes = lw * cpad * 4
    cost = pl.CostEstimate(
        flops=int(2 * n * lw * cpad * kk * cpad + res_flops), transcendentals=0,
        bytes_accessed=int(x2.size * 2 + w2flat.size * 2 + res.size * 2 + lw * 4
                           + n * lw * cpad * 2 + n * 8 * cpad * 4))
    return pl.pallas_call(
        kern,
        out_shape=(jax.ShapeDtypeStruct((n, lw, cpad), jnp.bfloat16),
                   jax.ShapeDtypeStruct((n * 8, cpad), jnp.float32)),
        grid=(n,),
        in_specs=[pl.BlockSpec((1, L, cpad), lambda i: (i, 0, 0)),
                  pl.BlockSpec((kk * cpad, cpad), lambda i: (0, 0)),   # w2 resident
                  pl.BlockSpec((lw, 1), lambda i: (0, 0)),             # valid-col mask
                  pl.BlockSpec((1, lw, rc), lambda i: (i, 0, 0))]
                 + extra_specs,
        out_specs=(pl.BlockSpec((1, lw, cpad), lambda i: (i, 0, 0)),
                   pl.BlockSpec((8, cpad), lambda i: (i, 0))),
        compiler_params=_mosaic_params(block_bytes, acc_bytes),
        cost_estimate=cost,
    )(x2, w2flat, cmask, res, *extra_args)


def _bn_relu_rows(y, scale, shift, *, tb, out_dtype):
    mpad, cpad = y.shape
    nt = mpad // tb
    block_bytes = tb * cpad * (y.dtype.itemsize + jnp.dtype(out_dtype).itemsize) + 2 * cpad * 4
    return pl.pallas_call(
        _bn_relu_kernel,
        out_shape=jax.ShapeDtypeStruct((mpad, cpad), out_dtype),
        grid=(nt,),
        in_specs=[pl.BlockSpec((tb, cpad), lambda i: (i, 0)),
                  pl.BlockSpec((1, cpad), lambda i: (0, 0)),
                  pl.BlockSpec((1, cpad), lambda i: (0, 0))],
        out_specs=pl.BlockSpec((tb, cpad), lambda i: (i, 0)),
        compiler_params=_mosaic_params(block_bytes),
    )(y, scale, shift)


def _bn_relu_img(y, scale, shift, *, out_dtype):
    n, lw, cpad = y.shape
    block_bytes = lw * cpad * (y.dtype.itemsize + jnp.dtype(out_dtype).itemsize) + 2 * cpad * 4
    return pl.pallas_call(
        _bn_relu_kernel,
        out_shape=jax.ShapeDtypeStruct((n, lw, cpad), out_dtype),
        grid=(n,),
        in_specs=[pl.BlockSpec((1, lw, cpad), lambda i: (i, 0, 0)),
                  pl.BlockSpec((1, cpad), lambda i: (0, 0)),
                  pl.BlockSpec((1, cpad), lambda i: (0, 0))],
        out_specs=pl.BlockSpec((1, lw, cpad), lambda i: (i, 0, 0)),
        compiler_params=_mosaic_params(block_bytes),
    )(y, scale, shift)


# ---------------------------------------------------------------------------
# JAX-side glue (layout + tiny per-channel math only)
# ---------------------------------------------------------------------------

def _bn_coeffs(stats, counts, gamma, beta, cpad):
    """Chan/Welford combine of per-tile [sum, centered-M2] -> folded BN scale/shift."""
    st = stats.reshape(-1, 8, cpad)
    s = st[:, 0, :]                                        # (T, C) per-tile masked sums
    q = st[:, 1, :]                                        # (T, C) per-tile centered M2
    n = jnp.asarray(counts, jnp.float32).reshape(-1, 1)    # (T, 1) valid rows per tile
    m = jnp.sum(n)
    mean = jnp.sum(s, axis=0) / m
    mu_t = s / n
    m2 = jnp.sum(q, axis=0) + jnp.sum(n * jnp.square(mu_t - mean[None, :]), axis=0)
    var = jnp.maximum(m2 / m, 0.0)                         # biased var (BN training fwd)
    g = jnp.pad(gamma, (0, cpad - gamma.shape[0]))
    b = jnp.pad(beta, (0, cpad - beta.shape[0]))
    scale = g * lax.rsqrt(var + EPS)
    shift = b - mean * scale
    return scale.reshape(1, cpad), shift.reshape(1, cpad)


def _im2col(x_nhwc, kernel, stride, padding):
    """Extract conv patches (bf16). Returns (N*Ho*Wo, K*K*C), Ho, Wo."""
    n, h, w, c = x_nhwc.shape
    xp = jnp.pad(x_nhwc, ((0, 0), (padding, padding), (padding, padding), (0, 0)))
    ho = (h + 2 * padding - kernel) // stride + 1
    wo = (w + 2 * padding - kernel) // stride + 1
    cols = []
    for ki in range(kernel):
        for kj in range(kernel):
            patch = xp[:, ki:ki + stride * (ho - 1) + 1:stride,
                          kj:kj + stride * (wo - 1) + 1:stride, :]
            cols.append(patch)   # (N, Ho, Wo, C)
    patches = jnp.concatenate(cols, axis=-1)   # ordered (ki, kj, c) like HWIO weights
    return patches.reshape(n * ho * wo, kernel * kernel * c), ho, wo


def init_params(key, in_c, out_c, kernel):
    k1, k2, k3, k4, k5, k6, k7 = jax.random.split(key, 7)
    params = dict(
        w1=0.1 * jax.random.normal(k1, (kernel, kernel, in_c, out_c), jnp.float32),
        w2=0.1 * jax.random.normal(k2, (kernel, kernel, out_c, out_c), jnp.float32),
        g1=1.0 + 0.1 * jax.random.normal(k3, (out_c,), jnp.float32),
        b1=0.1 * jax.random.normal(k4, (out_c,), jnp.float32),
        g2=1.0 + 0.1 * jax.random.normal(k5, (out_c,), jnp.float32),
        b2=0.1 * jax.random.normal(k6, (out_c,), jnp.float32),
    )
    if in_c != out_c:   # self.projection is None when in_c == out_c
        params["wproj"] = 0.1 * jax.random.normal(k7, (in_c, out_c), jnp.float32)
    return params


def residual_block_forward(x_nchw, params, *, kernel, stride, padding, block_m=512):
    assert kernel % 2 == 1, "conv2 same-size residual add requires an odd kernel"
    # NCHW -> NHWC, bf16 up-front so all XLA-side layout work streams bf16.
    x = jnp.transpose(x_nchw, (0, 2, 3, 1)).astype(jnp.bfloat16)
    n, h, w, in_c = x.shape
    out_c = params["w1"].shape[-1]
    cpad = _round_up(out_c, LANE)

    # ---- stage 1: conv1 (im2col matmul) + BN + ReLU ----------------------------------
    # TODO(synk): conv1 still uses a JAX-side im2col (2.25x inflation at stride 2); a
    # strided variant of conv2's in-kernel shifted-matmul would remove it.
    p1, ho, wo = _im2col(x, kernel, stride, padding)
    m = n * ho * wo
    # >= 2 M tiles whenever possible so both v7x TensorCores get work.
    tm = _round_up(max(SUBLANE, min(block_m, (m + 1) // 2)), SUBLANE)
    mpad = _round_up(m, tm)
    nt1 = mpad // tm

    p1b = _pad_rows(p1, mpad)
    w1m = _pad_cols(params["w1"].reshape(kernel * kernel * in_c, out_c),
                    cpad).astype(jnp.bfloat16)
    rmask1 = (jnp.arange(mpad) < m).astype(jnp.float32).reshape(mpad, 1)
    y1, st1 = _matmul_stats(p1b, w1m, rmask1, tm=tm)
    counts1 = [min(tm, m - i * tm) for i in range(nt1)]
    sc1, sh1 = _bn_coeffs(st1, counts1, params["g1"], params["b1"], cpad)
    tb1 = _pick_rows_tile(mpad, tm, cpad, 2)              # streaming tile, decoupled from tm
    out1 = _bn_relu_rows(y1, sc1, sh1, tb=tb1, out_dtype=jnp.bfloat16)   # (mpad, cpad) bf16

    # ---- stage 2: conv2 + residual + BN + ReLU (fused, no im2col) --------------------
    p2 = (kernel - 1) // 2
    wp_ = wo + 2 * p2                      # conv2 padded width
    hp_ = ho + 2 * p2 + 1                  # +1 extra zero row for the flattened shifts
    lw = ho * wp_                          # "wide" output rows per image
    out1_img = out1[:m].reshape(n, ho, wo, cpad)
    x2 = jnp.pad(out1_img, ((0, 0), (p2, p2 + 1), (p2, p2), (0, 0)))
    x2 = x2.reshape(n, hp_ * wp_, cpad)    # spatially padded, flattened NHWC (bf16)

    w2flat = jnp.pad(params["w2"],
                     ((0, 0), (0, 0), (0, cpad - out_c), (0, cpad - out_c))
                     ).astype(jnp.bfloat16).reshape(kernel * kernel * cpad, cpad)

    xs = x[:, ::stride, ::stride, :]       # residual input, == x[:, :, ::s, ::s] in NCHW
    assert xs.shape[1:3] == (ho, wo), "residual / conv1 spatial size mismatch"
    xsw = jnp.pad(xs, ((0, 0), (0, 0), (0, wp_ - wo), (0, 0)))   # widen W to wp_
    if "wproj" in params:
        res = xsw.reshape(n, lw, in_c)                           # bf16 residual input
        wproj = _pad_cols(params["wproj"], cpad).astype(jnp.bfloat16)
    else:
        res = jnp.pad(xsw, ((0, 0), (0, 0), (0, 0), (0, cpad - in_c))).reshape(n, lw, cpad)
        wproj = None
    cmask = (jnp.arange(lw) % wp_ < wo).astype(jnp.float32).reshape(lw, 1)

    y2, st2 = _conv2_res_stats(x2, w2flat, cmask, res, wproj,
                               K=kernel, wp=wp_, lw=lw, cpad=cpad)
    sc2, sh2 = _bn_coeffs(st2, [ho * wo] * n, params["g2"], params["b2"], cpad)
    out_wide = _bn_relu_img(y2, sc2, sh2, out_dtype=jnp.float32)   # (n, lw, cpad) f32

    # TODO(synk): returning NHWC would drop this final slice+transpose HBM pass.
    out = out_wide.reshape(n, ho, wp_, cpad)[:, :, :wo, :out_c]
    return jnp.transpose(out, (0, 3, 1, 2))   # back to NCHW


# ---------------------------------------------------------------------------
# Pure-JAX reference (lax convs, f32 HIGHEST) for validation
# ---------------------------------------------------------------------------

def ref_residual_block(x_nchw, params, *, kernel, stride, padding):
    dn = ("NCHW", "HWIO", "NCHW")
    prec = lax.Precision.HIGHEST
    x = x_nchw.astype(jnp.float32)
    in_c = x.shape[1]
    out_c = params["w1"].shape[-1]

    def bn(y, g, b):
        mean = y.mean(axis=(0, 2, 3), keepdims=True)
        var = jnp.square(y - mean).mean(axis=(0, 2, 3), keepdims=True)
        return ((y - mean) / jnp.sqrt(var + EPS) * g.reshape(1, -1, 1, 1)
                + b.reshape(1, -1, 1, 1))

    y = lax.conv_general_dilated(x, params["w1"], (stride, stride),
                                 [(padding, padding), (padding, padding)],
                                 dimension_numbers=dn, precision=prec)
    y = jnp.maximum(bn(y, params["g1"], params["b1"]), 0.0)
    p = (kernel - 1) // 2
    y = lax.conv_general_dilated(y, params["w2"], (1, 1), [(p, p), (p, p)],
                                 dimension_numbers=dn, precision=prec)
    xs = x[:, :, ::stride, ::stride]
    if "wproj" in params:
        res = lax.conv_general_dilated(xs, params["wproj"].reshape(1, 1, in_c, out_c),
                                       (1, 1), [(0, 0), (0, 0)],
                                       dimension_numbers=dn, precision=prec)
    else:
        res = xs
    y = y + res
    y = jnp.maximum(bn(y, params["g2"], params["b2"]), 0.0)
    return y


if __name__ == "__main__":
    K, STRIDE, PAD = 3, 2, 1
    key = jax.random.PRNGKey(0)

    def run_case(case_id, in_c, out_c, tag):
        kx, kp = jax.random.split(jax.random.fold_in(key, case_id))
        x = jax.random.normal(kx, (2, in_c, 16, 16), jnp.float32)   # PyTorch NCHW input
        params = init_params(kp, in_c, out_c, K)
        # block_m=64 exercises a multi-tile grid (M = 2*8*8 = 128 rows -> 2 tiles) and the
        # cross-tile BN-stats combine at this toy size; use the default 512 at real sizes.
        fwd = jax.jit(functools.partial(residual_block_forward, kernel=K, stride=STRIDE,
                                        padding=PAD, block_m=64))
        out = jax.block_until_ready(fwd(x, params))
        ref = ref_residual_block(x, params, kernel=K, stride=STRIDE, padding=PAD)
        assert out.shape == ref.shape == (2, out_c, 8, 8)
        # bf16 MXU operands AND bf16 intermediate storage (per perf guidance) vs a full
        # f32 reference => looser absolute tolerance, backed by a relative-L2 check.
        err = float(jnp.max(jnp.abs(out - ref)))
        rel = float(jnp.linalg.norm(out - ref) / (jnp.linalg.norm(ref) + 1e-12))
        assert err < 0.12, f"[{tag}] max abs error too large: {err}"
        assert rel < 0.06, f"[{tag}] relative L2 error too large: {rel}"

    run_case(1, 4, 8, "projection")   # in_c != out_c -> fused 1x1 projection path
    run_case(2, 8, 8, "identity")     # in_c == out_c -> elementwise residual add path
    print("KERNEL_OK")
</pallas_src>

<mosaic_0001>
module attributes {stable_mosaic.version = 11 : i64} {
  func.func @_mm_stats_kernel(%arg0: i32, %arg1: memref<64x36xbf16, #tpu.memory_space<vmem>>, %arg2: memref<36x128xbf16, #tpu.memory_space<vmem>>, %arg3: memref<64x1xf32, #tpu.memory_space<vmem>>, %arg4: memref<64x128xbf16, #tpu.memory_space<vmem>>, %arg5: memref<8x128xf32, #tpu.memory_space<vmem>>) attributes {dimension_semantics = [#tpu.dimension_semantics<parallel>], iteration_bounds = array<i64: 2>, scalar_prefetch = 0 : i64, scratch_operands = 0 : i64, tpu.core_type = #tpu.core_type<tc>, window_params = [{transform_indices = @transform_0, window_bounds = array<i64: 64, 36>}, {pipeline_mode = #tpu.pipeline_mode<synchronous>, transform_indices = @transform_1, window_bounds = array<i64: 36, 128>}, {transform_indices = @transform_2, window_bounds = array<i64: 64, 1>}, {transform_indices = @transform_3, window_bounds = array<i64: 64, 128>}, {transform_indices = @transform_4, window_bounds = array<i64: 8, 128>}]} {
    %c0 = arith.constant 0 : index
    %c0_0 = arith.constant 0 : index
    %0 = vector.load %arg1[%c0, %c0_0] : memref<64x36xbf16, #tpu.memory_space<vmem>>, vector<64x36xbf16>
    %c0_1 = arith.constant 0 : index
    %c0_2 = arith.constant 0 : index
    %1 = vector.load %arg2[%c0_1, %c0_2] : memref<36x128xbf16, #tpu.memory_space<vmem>>, vector<36x128xbf16>
    %cst = arith.constant dense<0.000000e+00> : vector<64x128xf32>
    %2 = tpu.matmul %0, %1, %cst {dimension_numbers = #tpu.dot_dimension_numbers<[1], [0], [0], [1], [0, 0, 1, 1], [], []>} : vector<64x36xbf16>, vector<36x128xbf16>, vector<64x128xf32> -> vector<64x128xf32>
    %3 = arith.truncf %2 : vector<64x128xf32> to vector<64x128xbf16>
    %c0_3 = arith.constant 0 : index
    %c0_4 = arith.constant 0 : index
    %4 = vector.load %arg4[%c0_3, %c0_4] : memref<64x128xbf16, #tpu.memory_space<vmem>>, vector<64x128xbf16>
    tpu.vector_store %arg4[%c0_3, %c0_4], %3 {strides = array<i32>} : memref<64x128xbf16, #tpu.memory_space<vmem>>, vector<64x128xbf16>,
    %c0_5 = arith.constant 0 : index
    %c0_6 = arith.constant 0 : index
    %5 = vector.load %arg3[%c0_5, %c0_6] : memref<64x1xf32, #tpu.memory_space<vmem>>, vector<64x1xf32>
    %6 = vector.broadcast %5 : vector<64x1xf32> to vector<64x128xf32>
    %7 = arith.mulf %2, %6 : vector<64x128xf32>
    %cst_7 = arith.constant dense<0.000000e+00> : vector<128xf32>
    %8 = vector.multi_reduction <add>, %7, %cst_7 [0] : vector<64x128xf32> to vector<128xf32>
    %9 = vector.shape_cast %8 : vector<128xf32> to vector<1x128xf32>
    %10 = vector.shape_cast %5 : vector<64x1xf32> to vector<1x64x1xf32>
    %cst_8 = arith.constant dense<0.000000e+00> : vector<1xf32>
    %11 = vector.multi_reduction <add>, %10, %cst_8 [1, 2] : vector<1x64x1xf32> to vector<1xf32>
    %12 = vector.shape_cast %11 : vector<1xf32> to vector<1x1x1xf32>
    %13 = vector.extract %12[0, 0, 0] : f32 from vector<1x1x1xf32>
    %cst_9 = arith.constant 1.000000e+00 : f32
    %14 = arith.maximumf %13, %cst_9 : f32
    %15 = vector.broadcast %14 : f32 to vector<1x128xf32>
    %16 = arith.divf %9, %15 : vector<1x128xf32>
    %17 = vector.broadcast %16 : vector<1x128xf32> to vector<64x128xf32>
    %18 = arith.subf %2, %17 : vector<64x128xf32>
    %19 = vector.broadcast %5 : vector<64x1xf32> to vector<64x128xf32>
    %20 = arith.mulf %18, %19 : vector<64x128xf32>
    %21 = arith.mulf %20, %20 : vector<64x128xf32>
    %cst_10 = arith.constant dense<0.000000e+00> : vector<128xf32>
    %22 = vector.multi_reduction <add>, %21, %cst_10 [0] : vector<64x128xf32> to vector<128xf32>
    %23 = vector.shape_cast %22 : vector<128xf32> to vector<1x128xf32>
    %24 = tpu.iota {dimensions = array<i32: 0>} : vector<8x128xi32>
    %c0_i32 = arith.constant 0 : i32
    %25 = vector.broadcast %c0_i32 : i32 to vector<8x128xi32>
    %26 = arith.cmpi eq, %24, %25 : vector<8x128xi32>
    %c1_i32 = arith.constant 1 : i32
    %27 = vector.broadcast %c1_i32 : i32 to vector<8x128xi32>
    %28 = arith.cmpi eq, %24, %27 : vector<8x128xi32>
    %cst_11 = arith.constant 0.000000e+00 : f32
    %29 = vector.shape_cast %23 : vector<1x128xf32> to vector<1x128xf32>
    %30 = vector.broadcast %29 : vector<1x128xf32> to vector<8x128xf32>
    %31 = vector.broadcast %cst_11 : f32 to vector<8x128xf32>
    %32 = arith.select %28, %30, %31 : vector<8x128xi1>, vector<8x128xf32>
    %33 = vector.shape_cast %9 : vector<1x128xf32> to vector<1x128xf32>
    %34 = vector.broadcast %33 : vector<1x128xf32> to vector<8x128xf32>
    %35 = arith.select %26, %34, %32 : vector<8x128xi1>, vector<8x128xf32>
    %c0_12 = arith.constant 0 : index
    %c0_13 = arith.constant 0 : index
    %36 = vector.load %arg5[%c0_12, %c0_13] : memref<8x128xf32, #tpu.memory_space<vmem>>, vector<8x128xf32>
    tpu.vector_store %arg5[%c0_12, %c0_13], %35 {strides = array<i32>} : memref<8x128xf32, #tpu.memory_space<vmem>>, vector<8x128xf32>,
    return
  }
  func.func @transform_0(%arg0: i32) -> (i32, i32) {
    %c0_i32 = arith.constant 0 : i32
    %c0_i32_0 = arith.constant 0 : i32
    return %arg0, %c0_i32 : i32, i32
  }
  func.func @transform_1(%arg0: i32) -> (i32, i32) {
    %c0_i32 = arith.constant 0 : i32
    %c0_i32_0 = arith.constant 0 : i32
    %c0_i32_1 = arith.constant 0 : i32
    return %c0_i32, %c0_i32_0 : i32, i32
  }
  func.func @transform_2(%arg0: i32) -> (i32, i32) {
    %c0_i32 = arith.constant 0 : i32
    %c0_i32_0 = arith.constant 0 : i32
    return %arg0, %c0_i32 : i32, i32
  }
  func.func @transform_3(%arg0: i32) -> (i32, i32) {
    %c0_i32 = arith.constant 0 : i32
    %c0_i32_0 = arith.constant 0 : i32
    return %arg0, %c0_i32 : i32, i32
  }
  func.func @transform_4(%arg0: i32) -> (i32, i32) {
    %c0_i32 = arith.constant 0 : i32
    %c0_i32_0 = arith.constant 0 : i32
    return %arg0, %c0_i32 : i32, i32
  }
}

module attributes {stable_mosaic.version = 11 : i64} {
  func.func @_bn_relu_kernel(%arg0: i32, %arg1: memref<64x128xbf16, #tpu.memory_space<vmem>>, %arg2: memref<1x128xf32, #tpu.memory_space<vmem>>, %arg3: memref<1x128xf32, #tpu.memory_space<vmem>>, %arg4: memref<64x128xbf16, #tpu.memory_space<vmem>>) attributes {dimension_semantics = [#tpu.dimension_semantics<parallel>], iteration_bounds = array<i64: 2>, scalar_prefetch = 0 : i64, scratch_operands = 0 : i64, tpu.core_type = #tpu.core_type<tc>, window_params = [{transform_indices = @transform_0, window_bounds = array<i64: 64, 128>}, {pipeline_mode = #tpu.pipeline_mode<synchronous>, transform_indices = @transform_1, window_bounds = array<i64: 1, 128>}, {pipeline_mode = #tpu.pipeline_mode<synchronous>, transform_indices = @transform_2, window_bounds = array<i64: 1, 128>}, {transform_indices = @transform_3, window_bounds = array<i64: 64, 128>}]} {
    %c0 = arith.constant 0 : index
    %c0_0 = arith.constant 0 : index
    %0 = vector.load %arg1[%c0, %c0_0] : memref<64x128xbf16, #tpu.memory_space<vmem>>, vector<64x128xbf16>
    %1 = arith.extf %0 : vector<64x128xbf16> to vector<64x128xf32>
    %c0_1 = arith.constant 0 : index
    %c0_2 = arith.constant 0 : index
    %2 = vector.load %arg2[%c0_1, %c0_2] : memref<1x128xf32, #tpu.memory_space<vmem>>, vector<1x128xf32>
    %3 = vector.broadcast %2 : vector<1x128xf32> to vector<64x128xf32>
    %4 = arith.mulf %1, %3 : vector<64x128xf32>
    %c0_3 = arith.constant 0 : index
    %c0_4 = arith.constant 0 : index
    %5 = vector.load %arg3[%c0_3, %c0_4] : memref<1x128xf32, #tpu.memory_space<vmem>>, vector<1x128xf32>
    %6 = vector.broadcast %5 : vector<1x128xf32> to vector<64x128xf32>
    %7 = arith.addf %4, %6 : vector<64x128xf32>
    %cst = arith.constant 0.000000e+00 : f32
    %8 = vector.broadcast %cst : f32 to vector<64x128xf32>
    %9 = arith.maximumf %7, %8 : vector<64x128xf32>
    %10 = arith.truncf %9 : vector<64x128xf32> to vector<64x128xbf16>
    %c0_5 = arith.constant 0 : index
    %c0_6 = arith.constant 0 : index
    %11 = vector.load %arg4[%c0_5, %c0_6] : memref<64x128xbf16, #tpu.memory_space<vmem>>, vector<64x128xbf16>
    tpu.vector_store %arg4[%c0_5, %c0_6], %10 {strides = array<i32>} : memref<64x128xbf16, #tpu.memory_space<vmem>>, vector<64x128xbf16>,
    return
  }
  func.func @transform_0(%arg0: i32) -> (i32, i32) {
    %c0_i32 = arith.constant 0 : i32
    %c0_i32_0 = arith.constant 0 : i32
    return %arg0, %c0_i32 : i32, i32
  }
  func.func @transform_1(%arg0: i32) -> (i32, i32) {
    %c0_i32 = arith.constant 0 : i32
    %c0_i32_0 = arith.constant 0 : i32
    %c0_i32_1 = arith.constant 0 : i32
    return %c0_i32, %c0_i32_0 : i32, i32
  }
  func.func @transform_2(%arg0: i32) -> (i32, i32) {
    %c0_i32 = arith.constant 0 : i32
    %c0_i32_0 = arith.constant 0 : i32
    %c0_i32_1 = arith.constant 0 : i32
    return %c0_i32, %c0_i32_0 : i32, i32
  }
  func.func @transform_3(%arg0: i32) -> (i32, i32) {
    %c0_i32 = arith.constant 0 : i32
    %c0_i32_0 = arith.constant 0 : i32
    return %arg0, %c0_i32 : i32, i32
  }
}

module attributes {stable_mosaic.version = 11 : i64} {
  func.func @_bn_relu_kernel(%arg0: i32, %arg1: memref<1x80x128xbf16, #tpu.memory_space<vmem>>, %arg2: memref<1x128xf32, #tpu.memory_space<vmem>>, %arg3: memref<1x128xf32, #tpu.memory_space<vmem>>, %arg4: memref<1x80x128xf32, #tpu.memory_space<vmem>>) attributes {dimension_semantics = [#tpu.dimension_semantics<parallel>], iteration_bounds = array<i64: 2>, scalar_prefetch = 0 : i64, scratch_operands = 0 : i64, tpu.core_type = #tpu.core_type<tc>, window_params = [{transform_indices = @transform_0, window_bounds = array<i64: 1, 80, 128>}, {pipeline_mode = #tpu.pipeline_mode<synchronous>, transform_indices = @transform_1, window_bounds = array<i64: 1, 128>}, {pipeline_mode = #tpu.pipeline_mode<synchronous>, transform_indices = @transform_2, window_bounds = array<i64: 1, 128>}, {transform_indices = @transform_3, window_bounds = array<i64: 1, 80, 128>}]} {
    %c0 = arith.constant 0 : index
    %c0_0 = arith.constant 0 : index
    %c0_1 = arith.constant 0 : index
    %0 = vector.load %arg1[%c0, %c0_0, %c0_1] : memref<1x80x128xbf16, #tpu.memory_space<vmem>>, vector<1x80x128xbf16>
    %1 = arith.extf %0 : vector<1x80x128xbf16> to vector<1x80x128xf32>
    %c0_2 = arith.constant 0 : index
    %c0_3 = arith.constant 0 : index
    %2 = vector.load %arg2[%c0_2, %c0_3] : memref<1x128xf32, #tpu.memory_space<vmem>>, vector<1x128xf32>
    %3 = vector.shape_cast %2 : vector<1x128xf32> to vector<1x1x128xf32>
    %4 = vector.broadcast %3 : vector<1x1x128xf32> to vector<1x80x128xf32>
    %5 = arith.mulf %1, %4 : vector<1x80x128xf32>
    %c0_4 = arith.constant 0 : index
    %c0_5 = arith.constant 0 : index
    %6 = vector.load %arg3[%c0_4, %c0_5] : memref<1x128xf32, #tpu.memory_space<vmem>>, vector<1x128xf32>
    %7 = vector.shape_cast %6 : vector<1x128xf32> to vector<1x1x128xf32>
    %8 = vector.broadcast %7 : vector<1x1x128xf32> to vector<1x80x128xf32>
    %9 = arith.addf %5, %8 : vector<1x80x128xf32>
    %cst = arith.constant 0.000000e+00 : f32
    %10 = vector.broadcast %cst : f32 to vector<1x80x128xf32>
    %11 = arith.maximumf %9, %10 : vector<1x80x128xf32>
    %c0_6 = arith.constant 0 : index
    %c0_7 = arith.constant 0 : index
    %c0_8 = arith.constant 0 : index
    %12 = vector.load %arg4[%c0_6, %c0_7, %c0_8] : memref<1x80x128xf32, #tpu.memory_space<vmem>>, vector<1x80x128xf32>
    tpu.vector_store %arg4[%c0_6, %c0_7, %c0_8], %11 {strides = array<i32>} : memref<1x80x128xf32, #tpu.memory_space<vmem>>, vector<1x80x128xf32>,
    return
  }
  func.func @transform_0(%arg0: i32) -> (i32, i32, i32) {
    %c0_i32 = arith.constant 0 : i32
    %c0_i32_0 = arith.constant 0 : i32
    %c0_i32_1 = arith.constant 0 : i32
    return %arg0, %c0_i32, %c0_i32_0 : i32, i32, i32
  }
  func.func @transform_1(%arg0: i32) -> (i32, i32) {
    %c0_i32 = arith.constant 0 : i32
    %c0_i32_0 = arith.constant 0 : i32
    %c0_i32_1 = arith.constant 0 : i32
    return %c0_i32, %c0_i32_0 : i32, i32
  }
  func.func @transform_2(%arg0: i32) -> (i32, i32) {
    %c0_i32 = arith.constant 0 : i32
    %c0_i32_0 = arith.constant 0 : i32
    %c0_i32_1 = arith.constant 0 : i32
    return %c0_i32, %c0_i32_0 : i32, i32
  }
  func.func @transform_3(%arg0: i32) -> (i32, i32, i32) {
    %c0_i32 = arith.constant 0 : i32
    %c0_i32_0 = arith.constant 0 : i32
    %c0_i32_1 = arith.constant 0 : i32
    return %arg0, %c0_i32, %c0_i32_0 : i32, i32, i32
  }
}

module attributes {stable_mosaic.version = 11 : i64} {
  func.func @_conv2_proj_kernel(%arg0: i32, %arg1: memref<1x110x128xbf16, #tpu.memory_space<vmem>>, %arg2: memref<1152x128xbf16, #tpu.memory_space<vmem>>, %arg3: memref<80x1xf32, #tpu.memory_space<vmem>>, %arg4: memref<1x80x4xbf16, #tpu.memory_space<vmem>>, %arg5: memref<4x128xbf16, #tpu.memory_space<vmem>>, %arg6: memref<1x80x128xbf16, #tpu.memory_space<vmem>>, %arg7: memref<8x128xf32, #tpu.memory_space<vmem>>) attributes {dimension_semantics = [#tpu.dimension_semantics<parallel>], iteration_bounds = array<i64: 2>, scalar_prefetch = 0 : i64, scratch_operands = 0 : i64, tpu.core_type = #tpu.core_type<tc>, window_params = [{transform_indices = @transform_0, window_bounds = array<i64: 1, 110, 128>}, {pipeline_mode = #tpu.pipeline_mode<synchronous>, transform_indices = @transform_1, window_bounds = array<i64: 1152, 128>}, {pipeline_mode = #tpu.pipeline_mode<synchronous>, transform_indices = @transform_2, window_bounds = array<i64: 80, 1>}, {transform_indices = @transform_3, window_bounds = array<i64: 1, 80, 4>}, {pipeline_mode = #tpu.pipeline_mode<synchronous>, transform_indices = @transform_4, window_bounds = array<i64: 4, 128>}, {transform_indices = @transform_5, window_bounds = array<i64: 1, 80, 128>}, {transform_indices = @transform_6, window_bounds = array<i64: 8, 128>}]} {
    %c0 = arith.constant 0 : index
    %c0_0 = arith.constant 0 : index
    %c0_1 = arith.constant 0 : index
    %0 = vector.load %arg1[%c0, %c0_0, %c0_1] : memref<1x110x128xbf16, #tpu.memory_space<vmem>>, vector<1x80x128xbf16>
    %1 = vector.shape_cast %0 : vector<1x80x128xbf16> to vector<80x128xbf16>
    %c0_2 = arith.constant 0 : index
    %c0_3 = arith.constant 0 : index
    %2 = vector.load %arg2[%c0_2, %c0_3] : memref<1152x128xbf16, #tpu.memory_space<vmem>>, vector<128x128xbf16>
    %cst = arith.constant dense<0.000000e+00> : vector<80x128xf32>
    %3 = tpu.matmul %1, %2, %cst {dimension_numbers = #tpu.dot_dimension_numbers<[1], [0], [0], [1], [0, 0, 1, 1], [], []>} : vector<80x128xbf16>, vector<128x128xbf16>, vector<80x128xf32> -> vector<80x128xf32>
    %c0_4 = arith.constant 0 : index
    %c1 = arith.constant 1 : index
    %c0_5 = arith.constant 0 : index
    %4 = vector.load %arg1[%c0_4, %c1, %c0_5] : memref<1x110x128xbf16, #tpu.memory_space<vmem>>, vector<1x80x128xbf16>
    %5 = vector.shape_cast %4 : vector<1x80x128xbf16> to vector<80x128xbf16>
    %c128 = arith.constant 128 : index
    %c0_6 = arith.constant 0 : index
    %6 = vector.load %arg2[%c128, %c0_6] : memref<1152x128xbf16, #tpu.memory_space<vmem>>, vector<128x128xbf16>
    %cst_7 = arith.constant dense<0.000000e+00> : vector<80x128xf32>
    %7 = tpu.matmul %5, %6, %cst_7 {dimension_numbers = #tpu.dot_dimension_numbers<[1], [0], [0], [1], [0, 0, 1, 1], [], []>} : vector<80x128xbf16>, vector<128x128xbf16>, vector<80x128xf32> -> vector<80x128xf32>
    %8 = arith.addf %3, %7 : vector<80x128xf32>
    %c0_8 = arith.constant 0 : index
    %c2 = arith.constant 2 : index
    %c0_9 = arith.constant 0 : index
    %9 = vector.load %arg1[%c0_8, %c2, %c0_9] : memref<1x110x128xbf16, #tpu.memory_space<vmem>>, vector<1x80x128xbf16>
    %10 = vector.shape_cast %9 : vector<1x80x128xbf16> to vector<80x128xbf16>
    %c256 = arith.constant 256 : index
    %c0_10 = arith.constant 0 : index
    %11 = vector.load %arg2[%c256, %c0_10] : memref<1152x128xbf16, #tpu.memory_space<vmem>>, vector<128x128xbf16>
    %cst_11 = arith.constant dense<0.000000e+00> : vector<80x128xf32>
    %12 = tpu.matmul %10, %11, %cst_11 {dimension_numbers = #tpu.dot_dimension_numbers<[1], [0], [0], [1], [0, 0, 1, 1], [], []>} : vector<80x128xbf16>, vector<128x128xbf16>, vector<80x128xf32> -> vector<80x128xf32>
    %13 = arith.addf %8, %12 : vector<80x128xf32>
    %c0_12 = arith.constant 0 : index
    %c10 = arith.constant 10 : index
    %c0_13 = arith.constant 0 : index
    %14 = vector.load %arg1[%c0_12, %c10, %c0_13] : memref<1x110x128xbf16, #tpu.memory_space<vmem>>, vector<1x80x128xbf16>
    %15 = vector.shape_cast %14 : vector<1x80x128xbf16> to vector<80x128xbf16>
    %c384 = arith.constant 384 : index
    %c0_14 = arith.constant 0 : index
    %16 = vector.load %arg2[%c384, %c0_14] : memref<1152x128xbf16, #tpu.memory_space<vmem>>, vector<128x128xbf16>
    %cst_15 = arith.constant dense<0.000000e+00> : vector<80x128xf32>
    %17 = tpu.matmul %15, %16, %cst_15 {dimension_numbers = #tpu.dot_dimension_numbers<[1], [0], [0], [1], [0, 0, 1, 1], [], []>} : vector<80x128xbf16>, vector<128x128xbf16>, vector<80x128xf32> -> vector<80x128xf32>
    %18 = arith.addf %13, %17 : vector<80x128xf32>
    %c0_16 = arith.constant 0 : index
    %c11 = arith.constant 11 : index
    %c0_17 = arith.constant 0 : index
    %19 = vector.load %arg1[%c0_16, %c11, %c0_17] : memref<1x110x128xbf16, #tpu.memory_space<vmem>>, vector<1x80x128xbf16>
    %20 = vector.shape_cast %19 : vector<1x80x128xbf16> to vector<80x128xbf16>
    %c512 = arith.constant 512 : index
    %c0_18 = arith.constant 0 : index
    %21 = vector.load %arg2[%c512, %c0_18] : memref<1152x128xbf16, #tpu.memory_space<vmem>>, vector<128x128xbf16>
    %cst_19 = arith.constant dense<0.000000e+00> : vector<80x128xf32>
    %22 = tpu.matmul %20, %21, %cst_19 {dimension_numbers = #tpu.dot_dimension_numbers<[1], [0], [0], [1], [0, 0, 1, 1], [], []>} : vector<80x128xbf16>, vector<128x128xbf16>, vector<80x128xf32> -> vector<80x128xf32>
    %23 = arith.addf %18, %22 : vector<80x128xf32>
    %c0_20 = arith.constant 0 : index
    %c12 = arith.constant 12 : index
    %c0_21 = arith.constant 0 : index
    %24 = vector.load %arg1[%c0_20, %c12, %c0_21] : memref<1x110x128xbf16, #tpu.memory_space<vmem>>, vector<1x80x128xbf16>
    %25 = vector.shape_cast %24 : vector<1x80x128xbf16> to vector<80x128xbf16>
    %c640 = arith.constant 640 : index
    %c0_22 = arith.constant 0 : index
    %26 = vector.load %arg2[%c640, %c0_22] : memref<1152x128xbf16, #tpu.memory_space<vmem>>, vector<128x128xbf16>
    %cst_23 = arith.constant dense<0.000000e+00> : vector<80x128xf32>
    %27 = tpu.matmul %25, %26, %cst_23 {dimension_numbers = #tpu.dot_dimension_numbers<[1], [0], [0], [1], [0, 0, 1, 1], [], []>} : vector<80x128xbf16>, vector<128x128xbf16>, vector<80x128xf32> -> vector<80x128xf32>
    %28 = arith.addf %23, %27 : vector<80x128xf32>
    %c0_24 = arith.constant 0 : index
    %c20 = arith.constant 20 : index
    %c0_25 = arith.constant 0 : index
    %29 = vector.load %arg1[%c0_24, %c20, %c0_25] : memref<1x110x128xbf16, #tpu.memory_space<vmem>>, vector<1x80x128xbf16>
    %30 = vector.shape_cast %29 : vector<1x80x128xbf16> to vector<80x128xbf16>
    %c768 = arith.constant 768 : index
    %c0_26 = arith.constant 0 : index
    %31 = vector.load %arg2[%c768, %c0_26] : memref<1152x128xbf16, #tpu.memory_space<vmem>>, vector<128x128xbf16>
    %cst_27 = arith.constant dense<0.000000e+00> : vector<80x128xf32>
    %32 = tpu.matmul %30, %31, %cst_27 {dimension_numbers = #tpu.dot_dimension_numbers<[1], [0], [0], [1], [0, 0, 1, 1], [], []>} : vector<80x128xbf16>, vector<128x128xbf16>, vector<80x128xf32> -> vector<80x128xf32>
    %33 = arith.addf %28, %32 : vector<80x128xf32>
    %c0_28 = arith.constant 0 : index
    %c21 = arith.constant 21 : index
    %c0_29 = arith.constant 0 : index
    %34 = vector.load %arg1[%c0_28, %c21, %c0_29] : memref<1x110x128xbf16, #tpu.memory_space<vmem>>, vector<1x80x128xbf16>
    %35 = vector.shape_cast %34 : vector<1x80x128xbf16> to vector<80x128xbf16>
    %c896 = arith.constant 896 : index
    %c0_30 = arith.constant 0 : index
    %36 = vector.load %arg2[%c896, %c0_30] : memref<1152x128xbf16, #tpu.memory_space<vmem>>, vector<128x128xbf16>
    %cst_31 = arith.constant dense<0.000000e+00> : vector<80x128xf32>
    %37 = tpu.matmul %35, %36, %cst_31 {dimension_numbers = #tpu.dot_dimension_numbers<[1], [0], [0], [1], [0, 0, 1, 1], [], []>} : vector<80x128xbf16>, vector<128x128xbf16>, vector<80x128xf32> -> vector<80x128xf32>
    %38 = arith.addf %33, %37 : vector<80x128xf32>
    %c0_32 = arith.constant 0 : index
    %c22 = arith.constant 22 : index
    %c0_33 = arith.constant 0 : index
    %39 = vector.load %arg1[%c0_32, %c22, %c0_33] : memref<1x110x128xbf16, #tpu.memory_space<vmem>>, vector<1x80x128xbf16>
    %40 = vector.shape_cast %39 : vector<1x80x128xbf16> to vector<80x128xbf16>
    %c1024 = arith.constant 1024 : index
    %c0_34 = arith.constant 0 : index
    %41 = vector.load %arg2[%c1024, %c0_34] : memref<1152x128xbf16, #tpu.memory_space<vmem>>, vector<128x128xbf16>
    %cst_35 = arith.constant dense<0.000000e+00> : vector<80x128xf32>
    %42 = tpu.matmul %40, %41, %cst_35 {dimension_numbers = #tpu.dot_dimension_numbers<[1], [0], [0], [1], [0, 0, 1, 1], [], []>} : vector<80x128xbf16>, vector<128x128xbf16>, vector<80x128xf32> -> vector<80x128xf32>
    %43 = arith.addf %38, %42 : vector<80x128xf32>
    %c0_36 = arith.constant 0 : index
    %c0_37 = arith.constant 0 : index
    %c0_38 = arith.constant 0 : index
    %44 = vector.load %arg4[%c0_36, %c0_37, %c0_38] : memref<1x80x4xbf16, #tpu.memory_space<vmem>>, vector<1x80x4xbf16>
    %45 = vector.shape_cast %44 : vector<1x80x4xbf16> to vector<80x4xbf16>
    %c0_39 = arith.constant 0 : index
    %c0_40 = arith.constant 0 : index
    %46 = vector.load %arg5[%c0_39, %c0_40] : memref<4x128xbf16, #tpu.memory_space<vmem>>, vector<4x128xbf16>
    %cst_41 = arith.constant dense<0.000000e+00> : vector<80x128xf32>
    %47 = tpu.matmul %45, %46, %cst_41 {dimension_numbers = #tpu.dot_dimension_numbers<[1], [0], [0], [1], [0, 0, 1, 1], [], []>} : vector<80x4xbf16>, vector<4x128xbf16>, vector<80x128xf32> -> vector<80x128xf32>
    %48 = arith.addf %43, %47 : vector<80x128xf32>
    %c0_42 = arith.constant 0 : index
    %c0_43 = arith.constant 0 : index
    %49 = vector.load %arg3[%c0_42, %c0_43] : memref<80x1xf32, #tpu.memory_space<vmem>>, vector<80x1xf32>
    %50 = vector.broadcast %49 : vector<80x1xf32> to vector<80x128xf32>
    %51 = arith.mulf %48, %50 : vector<80x128xf32>
    %52 = arith.truncf %51 : vector<80x128xf32> to vector<80x128xbf16>
    %c0_44 = arith.constant 0 : index
    %c0_45 = arith.constant 0 : index
    %c0_46 = arith.constant 0 : index
    %53 = vector.load %arg6[%c0_44, %c0_45, %c0_46] : memref<1x80x128xbf16, #tpu.memory_space<vmem>>, vector<1x80x128xbf16>
    %54 = vector.shape_cast %53 : vector<1x80x128xbf16> to vector<80x128xbf16>
    %55 = vector.shape_cast %52 : vector<80x128xbf16> to vector<1x80x128xbf16>
    tpu.vector_store %arg6[%c0_44, %c0_45, %c0_46], %55 {strides = array<i32>} : memref<1x80x128xbf16, #tpu.memory_space<vmem>>, vector<1x80x128xbf16>,
    %56 = vector.broadcast %49 : vector<80x1xf32> to vector<80x128xf32>
    %57 = arith.mulf %48, %56 : vector<80x128xf32>
    %cst_47 = arith.constant dense<0.000000e+00> : vector<128xf32>
    %58 = vector.multi_reduction <add>, %57, %cst_47 [0] : vector<80x128xf32> to vector<128xf32>
    %59 = vector.shape_cast %58 : vector<128xf32> to vector<1x128xf32>
    %60 = vector.shape_cast %49 : vector<80x1xf32> to vector<1x80x1xf32>
    %cst_48 = arith.constant dense<0.000000e+00> : vector<1xf32>
    %61 = vector.multi_reduction <add>, %60, %cst_48 [1, 2] : vector<1x80x1xf32> to vector<1xf32>
    %62 = vector.shape_cast %61 : vector<1xf32> to vector<1x1x1xf32>
    %63 = vector.extract %62[0, 0, 0] : f32 from vector<1x1x1xf32>
    %cst_49 = arith.constant 1.000000e+00 : f32
    %64 = arith.maximumf %63, %cst_49 : f32
    %65 = vector.broadcast %64 : f32 to vector<1x128xf32>
    %66 = arith.divf %59, %65 : vector<1x128xf32>
    %67 = vector.broadcast %66 : vector<1x128xf32> to vector<80x128xf32>
    %68 = arith.subf %48, %67 : vector<80x128xf32>
    %69 = vector.broadcast %49 : vector<80x1xf32> to vector<80x128xf32>
    %70 = arith.mulf %68, %69 : vector<80x128xf32>
    %71 = arith.mulf %70, %70 : vector<80x128xf32>
    %cst_50 = arith.constant dense<0.000000e+00> : vector<128xf32>
    %72 = vector.multi_reduction <add>, %71, %cst_50 [0] : vector<80x128xf32> to vector<128xf32>
    %73 = vector.shape_cast %72 : vector<128xf32> to vector<1x128xf32>
    %74 = tpu.iota {dimensions = array<i32: 0>} : vector<8x128xi32>
    %c0_i32 = arith.constant 0 : i32
    %75 = vector.broadcast %c0_i32 : i32 to vector<8x128xi32>
    %76 = arith.cmpi eq, %74, %75 : vector<8x128xi32>
    %c1_i32 = arith.constant 1 : i32
    %77 = vector.broadcast %c1_i32 : i32 to vector<8x128xi32>
    %78 = arith.cmpi eq, %74, %77 : vector<8x128xi32>
    %cst_51 = arith.constant 0.000000e+00 : f32
    %79 = vector.shape_cast %73 : vector<1x128xf32> to vector<1x128xf32>
    %80 = vector.broadcast %79 : vector<1x128xf32> to vector<8x128xf32>
    %81 = vector.broadcast %cst_51 : f32 to vector<8x128xf32>
    %82 = arith.select %78, %80, %81 : vector<8x128xi1>, vector<8x128xf32>
    %83 = vector.shape_cast %59 : vector<1x128xf32> to vector<1x128xf32>
    %84 = vector.broadcast %83 : vector<1x128xf32> to vector<8x128xf32>
    %85 = arith.select %76, %84, %82 : vector<8x128xi1>, vector<8x128xf32>
    %c0_52 = arith.constant 0 : index
    %c0_53 = arith.constant 0 : index
    %86 = vector.load %arg7[%c0_52, %c0_53] : memref<8x128xf32, #tpu.memory_space<vmem>>, vector<8x128xf32>
    tpu.vector_store %arg7[%c0_52, %c0_53], %85 {strides = array<i32>} : memref<8x128xf32, #tpu.memory_space<vmem>>, vector<8x128xf32>,
    return
  }
  func.func @transform_0(%arg0: i32) -> (i32, i32, i32) {
    %c0_i32 = arith.constant 0 : i32
    %c0_i32_0 = arith.constant 0 : i32
    %c0_i32_1 = arith.constant 0 : i32
    return %arg0, %c0_i32, %c0_i32_0 : i32, i32, i32
  }
  func.func @transform_1(%arg0: i32) -> (i32, i32) {
    %c0_i32 = arith.constant 0 : i32
    %c0_i32_0 = arith.constant 0 : i32
    %c0_i32_1 = arith.constant 0 : i32
    return %c0_i32, %c0_i32_0 : i32, i32
  }
  func.func @transform_2(%arg0: i32) -> (i32, i32) {
    %c0_i32 = arith.constant 0 : i32
    %c0_i32_0 = arith.constant 0 : i32
    %c0_i32_1 = arith.constant 0 : i32
    return %c0_i32, %c0_i32_0 : i32, i32
  }
  func.func @transform_3(%arg0: i32) -> (i32, i32, i32) {
    %c0_i32 = arith.constant 0 : i32
    %c0_i32_0 = arith.constant 0 : i32
    %c0_i32_1 = arith.constant 0 : i32
    return %arg0, %c0_i32, %c0_i32_0 : i32, i32, i32
  }
  func.func @transform_4(%arg0: i32) -> (i32, i32) {
    %c0_i32 = arith.constant 0 : i32
    %c0_i32_0 = arith.constant 0 : i32
    %c0_i32_1 = arith.constant 0 : i32
    return %c0_i32, %c0_i32_0 : i32, i32
  }
  func.func @transform_5(%arg0: i32) -> (i32, i32, i32) {
    %c0_i32 = arith.constant 0 : i32
    %c0_i32_0 = arith.constant 0 : i32
    %c0_i32_1 = arith.constant 0 : i32
    return %arg0, %c0_i32, %c0_i32_0 : i32, i32, i32
  }
  func.func @transform_6(%arg0: i32) -> (i32, i32) {
    %c0_i32 = arith.constant 0 : i32
    %c0_i32_0 = arith.constant 0 : i32
    return %arg0, %c0_i32 : i32, i32
  }
}

</mosaic_0001>

<bundles_post_ra>
// kernel: residual_block_forward.5
= control target key start
LH: loop header
LB: loop body
LE: loop exit
PB: predicated region body
PF: predicated region fallthrough
CT: control target
= control target key end

     0   :  { %s431_s12 = smov 0   ;;  %s461_s0 = inlined_call_operand.vmem [shape: bf16[128,128], index: 0, kind: input, shape index: {}]   ;;  %s462_s1 = inlined_call_operand.vmem [shape: f32[1,128], index: 1, kind: input, shape index: {}]   ;;  %s463_s2 = inlined_call_operand.vmem [shape: f32[1,128], index: 2, kind: input, shape index: {}]   ;;  %s464_s3 = inlined_call_operand.vmem [shape: bf16[128,128], index: 3, kind: output, shape index: {}]  }
   0x1 LB: > { %s324_s13 = sadd.s32 4294967295, %s409_s12   ;;  %p328_p0 = scmp.ge.s32.totalorder %s409_s12, 1  ;;  %s409_s12 = sphi %s431_s12, %s13_s12  }
   0x2   : > { %p138_p1 = scmp.lt.s32.totalorder %s409_s12, 3 }
   0x4   : > { %p139_p2 = pnand %p328_p0, %p138_p1 }
   0x5   : > { %s329_s14 = sshll.u32 (!%p139_p2), %s324_s13, 3  ;;  %v333_v0 = vld [vmem:[%s462_s1] ss:$0 sm:$0xff] (!%p139_p2) }
   0x6   : > { %142 = sbr.rel (%p139_p2) target bundleno = 29 (0x1d), region = 32  ;;  %p163_p3 = scmp.lt.s32.totalorder (!%p139_p2), %s329_s14, 15  ;;  %v334_v9 = vld [vmem:[%s463_s2] ss:$0 sm:$0xff] (!%p139_p2) }
   0xd   : > { %s466_s14 = smov (!%p163_p3, %s329_s14), 15 }
   0xe   : > { %s330_s15 = sshll.u32 %s466_s14, 2 }
   0xf   : > { %s166_s18 = scalar_lea.vmem %s461_s0, %s330_s15  ;;  %s172_s25 = scalar_lea.vmem %s464_s3, %s330_s15 }
  0x10   : > { %v354_v1 = vld [vmem:[%s166_s18] sm:$0xff]   ;;  %v389_v2 = vld [vmem:[%s166_s18 + $0x8] sm:$0xff]   ;;  %v390_v3 = vld [vmem:[%s166_s18 + $0x10] sm:$0xff]  }
  0x11   : > { %v355_v4 = vunpack.c.l.bf16 %v354_v1  ;;  %v356_v5 = vunpack.c.h.bf16 %v354_v1  ;;  %v359_v6 = vunpack.c.l.bf16 %v389_v2  ;;  %v360_v7 = vunpack.c.h.bf16 %v389_v2  ;;  %v391_v8 = vld [vmem:[%s166_s18 + $0x18] sm:$0xff]  }
  0x12   : > { %v363_v10 = vunpack.c.l.bf16 %v390_v3  ;;  %v364_v11 = vunpack.c.h.bf16 %v390_v3  ;;  %v367_v12 = vunpack.c.l.bf16 %v391_v8  ;;  %v368_v13 = vunpack.c.h.bf16 %v391_v8 }
  0x13   : > { %v197_v14 = vmul.f32 %v355_v4, %v333_v0  ;;  %v198_v15 = vmul.f32 %v356_v5, %v333_v0  ;;  %v199_v16 = vmul.f32 %v359_v6, %v333_v0  ;;  %v200_v17 = vmul.f32 %v360_v7, %v333_v0 }
  0x14   : > { %v201_v18 = vmul.f32 %v363_v10, %v333_v0  ;;  %v202_v19 = vmul.f32 %v364_v11, %v333_v0  ;;  %v203_v20 = vmul.f32 %v367_v12, %v333_v0  ;;  %v204_v21 = vmul.f32 %v368_v13, %v333_v0 }
  0x15   : > { %v212_v22 = vadd.f32 %v334_v9, %v197_v14  ;;  %v213_v23 = vadd.f32 %v334_v9, %v198_v15  ;;  %v214_v24 = vadd.f32 %v334_v9, %v199_v16  ;;  %v215_v25 = vadd.f32 %v334_v9, %v200_v17 }
  0x16   : > { %v216_v26 = vadd.f32 %v334_v9, %v201_v18  ;;  %v217_v27 = vadd.f32 %v334_v9, %v202_v19  ;;  %v218_v28 = vadd.f32 %v334_v9, %v203_v20  ;;  %v219_v29 = vadd.f32 %v334_v9, %v204_v21 }
  0x17   : > { %v220_v30 = vmax.f32 %v212_v22, 0.0  ;;  %v221_v31 = vmax.f32 %v213_v23, 0.0  ;;  %v222_v32 = vmax.f32 %v214_v24, 0.0  ;;  %v223_v33 = vmax.f32 %v215_v25, 0.0 }
  0x18   : > { %v224_v34 = vmax.f32 %v216_v26, 0.0  ;;  %v225_v35 = vmax.f32 %v217_v27, 0.0  ;;  %v226_v36 = vmax.f32 %v218_v28, 0.0  ;;  %v227_v37 = vmax.f32 %v219_v29, 0.0 }
  0x19   : > { %v372_v38 = vpack.c.bf16 %v221_v31, %v220_v30  ;;  %v377_v39 = vpack.c.bf16 %v223_v33, %v222_v32 }
  0x1a   : > { %v382_v40 = vpack.c.bf16 %v225_v35, %v224_v34  ;;  %v387_v41 = vpack.c.bf16 %v227_v37, %v226_v36 }
  0x1b   : > { %373 = vst [vmem:[%s172_s25] sm:$0xff] %v372_v38   ;;  %392 = vst [vmem:[%s172_s25 + $0x8] sm:$0xff] %v377_v39  }
  0x1c   : > { %393 = vst [vmem:[%s172_s25 + $0x10] sm:$0xff] %v382_v40   ;;  %394 = vst [vmem:[%s172_s25 + $0x18] sm:$0xff] %v387_v41  }
  0x1d PF: > { %s13_s12 = sadd.s32 1, %s409_s12  }
  0x1e   : > { %p10_p4 = scmp.ge.s32.totalorder %s13_s12, 4  }
  0x20   :  { %12 = sbr.rel (!%p10_p4) target bundleno = 1 (0x1), region = 62 }

// kernel: residual_block_forward.4
= control target key start
LH: loop header
LB: loop body
LE: loop exit
PB: predicated region body
PF: predicated region fallthrough
CT: control target
= control target key end

     0   :  { %s797_s15 = smov 0   ;;  %s872_s0 = inlined_call_operand.vmem [shape: bf16[128,36], index: 0, kind: input, shape index: {}]   ;;  %s873_s1 = inlined_call_operand.vmem [shape: bf16[36,128], index: 1, kind: input, shape index: {}]   ;;  %s874_s2 = inlined_call_operand.vmem [shape: f32[128,1], index: 2, kind: input, shape index: {}]   ;;  %s875_s3 = inlined_call_operand.vmem [shape: bf16[128,128], index: 3, kind: output, shape index: {0}]   ;;  %s876_s4 = inlined_call_operand.vmem [shape: f32[16,128], index: 4, kind: output, shape index: {1}]  }
   0x1 LB: > { %s803_s16 = sadd.s32 4294967295, %s768_s15   ;;  %p650_p0 = scmp.ge.s32.totalorder %s768_s15, 1  ;;  %s768_s15 = sphi %s797_s15, %s15_s15  }
   0x2   : > { %p177_p1 = scmp.lt.s32.totalorder %s768_s15, 3 }
   0x4   : > { %p178_p2 = pnand %p650_p0, %p177_p1 }
   0x5   : > { %v753_v0 = vld [vmem:[%s873_s1] sm:$0xff] (!%p178_p2)   ;;  %v754_v1 = vld [vmem:[%s873_s1 + $0x8] sm:$0xff] (!%p178_p2)   ;;  %s651_s21 = sshll.u32 (!%p178_p2), %s803_s16, 3  ;;  %v755_v2 = vld [vmem:[%s873_s1 + $0x10] ss:$0 sps:$4 sm:$0x33] (!%p178_p2)  }
   0x6   : > { %181 = sbr.rel (%p178_p2) target bundleno = 298 (0x12a), region = 32  ;;  %717 = vmatprep.subr.bf16.mxu0 (!%p178_p2), %v753_v0  ;;  %731 = vmatprep.subr.bf16.mxu1 (!%p178_p2), %v753_v0  ;;  %p213_p3 = scmp.lt.s32.totalorder (!%p178_p2), %s651_s21, 15  ;;  %vm296_vm0 = vcmask (!%p178_p2), 1041408   ;;  %v770_v3 = vmov (!%p178_p2), 0   ;;  %vm283_vm1 = vcmask (!%p178_p2), 293888   ;;  %vm474_vm2 = vcmask (!%p178_p2), 7168  }
   0x7   : > { %718 = vmatpush3.bf16.msra.mxu0 (!%p178_p2), %v753_v0  ;;  %734 = vmatpush3.bf16.msra.mxu1 (!%p178_p2), %v753_v0  ;;  %v298_v4 = vsel (!%p178_p2), %vm296_vm0, %v755_v2, 0  ;;  %s771_s10 = smov (!%p178_p2), 1.0   ;;  %p230_p4 = scmp.lt.s32.totalorder (!%p178_p2), %s803_s16, 1 }
   0x8   : > { %719 = vmatprep.subr.bf16.mxu0 (!%p178_p2), %v754_v1  ;;  %732 = vmatprep.subr.bf16.mxu1 (!%p178_p2), %v754_v1 }
   0x9   : > { %752 = vset.pattern.permute.xlu1 (!%p178_p2), %v770_v3  ;;  %751 = vset.pattern.permute.xlu0 (!%p178_p2), %v770_v3 }
   0xb   : > { %720 = vmatpush3.bf16.msra.mxu0 (!%p178_p2), %v754_v1  ;;  %735 = vmatpush3.bf16.msra.mxu1 (!%p178_p2), %v754_v1 }
   0xc   : > { %737 = vmatprep.subr.msk.bf16.mxu0 (!%p178_p2), %vm296_vm0, %v755_v2  ;;  %738 = vmatprep.subr.msk.bf16.mxu1 (!%p178_p2), %vm296_vm0, %v755_v2 }
   0xd   : > { %s878_s21 = smov (!%p213_p3, %s651_s21), 15  ;;  %s880_s16 = smov (!%p230_p4, %s803_s16), 1 }
   0xe   : > { %s652_s24 = sshll.u32 %s878_s21, 2  ;;  %s654_s25 = sshll.u32 %s878_s21, 3 }
   0xf   : > { %s216_s28 = scalar_lea.vmem %s872_s0, %s652_s24  ;;  %s222_s5 = scalar_lea.vmem %s874_s2, %s654_s25  ;;  %722 = vmatpush3.bf16.msra.mxu0 %v298_v4  ;;  %736 = vmatpush3.bf16.msra.mxu1 %v298_v4 }
  0x10   : > { %v756_v5 = vld [vmem:[%s216_s28] sm:$0xff]   ;;  %v757_v6 = vld [vmem:[%s216_s28 + $0x10] sm:$0xff]   ;;  %v758_v7 = vld [vmem:[%s216_s28 + $0x8] sm:$0xff]   ;;  %s228_s8 = scalar_lea.vmem %s875_s3, %s652_s24  ;;  %s657_s12 = sshll.u32 %s880_s16, 3 }
  0x11   : > { %723 = vmatprep.mubr.msk.bf16.mxu0 %vm283_vm1, %v756_v5  ;;  %v759_v8 = vld [vmem:[%s216_s28 + $0x18] sm:$0xff]   ;;  %727 = vmatprep.mubr.msk.bf16.mxu1 %vm283_vm1, %v757_v6  ;;  %v405_v9 = vld [vmem:[%s222_s5] sm:$0xff]  ;;  %v406_v10 = vld [vmem:[%s222_s5 + $0x8] sm:$0xff]  ;;  %s233_s17 = scalar_lea.vmem %s876_s4, %s657_s12 }
  0x12   : > { %v407_v11 = vld [vmem:[%s222_s5 + $0x10] sm:$0xff]  ;;  %v408_v12 = vld [vmem:[%s222_s5 + $0x18] sm:$0xff]  ;;  %v475_v13 = vsel %vm474_vm2, %v405_v9, 0.0  ;;  %v476_v14 = vsel %vm474_vm2, %v406_v10, 0.0  ;;  %420 = vperm.xlu1 %752, %v406_v10   ;;  %724 = vmatmul.mubr.msk.bf16.vlgmr.msra.gmra.mrb[0].mxu0 %vm283_vm1, %v758_v7  ;;  %v409_v16 = vld [vmem:[%s222_s5 + $0x20] sm:$0xff] }
  0x13   : > { %v478_v15 = vsel %vm474_vm2, %v407_v11, 0.0  ;;  %728 = vmatmul.mubr.msk.bf16.vlgmr.msra.gmra.mrb[0].mxu1 %vm283_vm1, %v759_v8  ;;  %v477_v17 = vadd.f32 %v476_v14, %v475_v13  ;;  %v480_v18 = vsel %vm474_vm2, %v408_v12, 0.0  ;;  %v410_v19 = vld [vmem:[%s222_s5 + $0x28] sm:$0xff]  ;;  %v482_v21 = vsel %vm474_vm2, %v409_v16, 0.0  ;;  %v411_v22 = vld [vmem:[%s222_s5 + $0x30] sm:$0xff]  ;;  %v412_v25 = vld [vmem:[%s222_s5 + $0x38] sm:$0xff] }
  0x14   : > { %v484_v24 = vsel %vm474_vm2, %v410_v19, 0.0  ;;  %v486_v27 = vsel %vm474_vm2, %v411_v22, 0.0  ;;  %v488_v29 = vsel %vm474_vm2, %v412_v25, 0.0 }
  0x15   : > { %v479_v20 = vadd.f32 %v478_v15, %v477_v17 }
  0x16   : > { %425 = vperm.xlu1 %752, %v407_v11  }
  0x17   : > { %v481_v23 = vadd.f32 %v480_v18, %v479_v20 }
  0x19   : > { %v483_v26 = vadd.f32 %v482_v21, %v481_v23 }
  0x1a   : > { %430 = vperm.xlu1 %752, %v408_v12  }
  0x1b   : > { %v485_v28 = vadd.f32 %v484_v24, %v483_v26 }
  0x1d   : > { %v487_v30 = vadd.f32 %v486_v27, %v485_v28 }
  0x1e   : > { %435 = vperm.xlu1 %752, %v409_v16  }
  0x1f   : > { %v489_v31 = vadd.f32 %v488_v29, %v487_v30 }
  0x21   : > { %490 = vadd.xlane.f32.xlu0 %v489_v31 }
  0x22   : > { %440 = vperm.xlu1 %752, %v410_v19  }
  0x26   : > { %445 = vperm.xlu1 %752, %v411_v22  }
  0x2a   : > { %450 = vperm.xlu1 %752, %v412_v25  }
  0x37   : > { %415 = vperm.xlu0 %751, %v405_v9  }
  0x91   : > { %v421_v39 = vpop.permute.xlu1 %420 }
  0x95   : > { %v426_v40 = vpop.permute.xlu1 %425 }
  0x99   : > { %v431_v41 = vpop.permute.xlu1 %430 }
  0x9d   : > { %v841_v42 = vpop.permute.xlu1 %435 }
  0xa1   : > { %v843_v43 = vpop.permute.xlu1 %440 }
  0xa5   : > { %v446_v63 = vpop.permute.xlu1 %445 }
  0xa9   : > { %v451_v6 = vpop.permute.xlu1 %450 }
  0xae   : > { %v491_v32 = vpop.xlane.xlu0 %490 }
  0xaf   : > { %v492_v33 = vrot.slane %v491_v32, 4 }
  0xb1   : > { %v493_v34 = vadd.f32 %v492_v33, %v491_v32 }
  0xb3   : > { %v494_v35 = vrot.slane %v493_v34, 2 }
  0xb5   : > { %v495_v36 = vadd.f32 %v494_v35, %v493_v34 }
  0xb6   : > { %v416_v44 = vpop.permute.xlu0 %415 }
  0xb7   : > { %v496_v37 = vrot.slane %v495_v36, 1 }
  0xb9   : > { %v497_v38 = vadd.f32 %v496_v37, %v495_v36 }
  0xbb   : > { %739 = vpush %v497_v38 }
  0xe5   : > { %v725_v45 = vpop.f32.mrb[0].mxu0 }
  0xe6   : > { %v845_v46 = vpop.f32.mrb[0].mxu1  ;;  %v334_v47 = vpop.f32.mrb[1].mxu0  ;;  %v455_v59 = vmul.f32 %v725_v45, %v426_v40 }
  0xe7   : > { %v350_v48 = vpop.f32.mrb[1].mxu1  ;;  %v726_v49 = vpop.f32.mrb[2].mxu0  ;;  %v453_v55 = vmul.f32 %v416_v44, %v334_v47  ;;  %v459_v4 = vmul.f32 %v845_v46, %v446_v63 }
  0xe8   : > { %v852_v50 = vpop.f32.mrb[2].mxu1  ;;  %v695_v51 = vpack.c.bf16 %v726_v49, %v725_v45  ;;  %v337_v53 = vpop.f32.mrb[3].mxu0  ;;  %v456_v61 = vmul.f32 %v726_v49, %v431_v41  ;;  %v457_v0 = vmul.f32 %v841_v42, %v350_v48 }
  0xe9   : > { %v705_v52 = vpack.c.bf16 %v852_v50, %v845_v46  ;;  %v353_v54 = vpop.f32.mrb[3].mxu1  ;;  %v690_v56 = vpack.c.bf16 %v337_v53, %v334_v47  ;;  %v454_v57 = vmul.f32 %v421_v39, %v337_v53  ;;  %v460_v7 = vmul.f32 %v852_v50, %v451_v6 }
  0xea   : > { %v700_v58 = vpack.c.bf16 %v353_v54, %v350_v48  ;;  %707 = vst [vmem:[%s228_s8 + $0x8] sm:$0xff] %v695_v51   ;;  %v458_v2 = vmul.f32 %v843_v43, %v353_v54 }
  0xeb   : > { %709 = vst [vmem:[%s228_s8 + $0x18] sm:$0xff] %v705_v52   ;;  %691 = vst [vmem:[%s228_s8] sm:$0xff] %v690_v56   ;;  %v461_v60 = vadd.f32 %v454_v57, %v453_v55  ;;  %v540_v52 = vlaneseq }
  0xec   : > { %708 = vst [vmem:[%s228_s8 + $0x10] sm:$0xff] %v700_v58   ;;  %s740_s9 = spop %739 }
  0xed   : > { %v462_v62 = vadd.f32 %v461_v60, %v455_v59  ;;  %s499_s11 = smax.f32 %s771_s10, %s740_s9 }
  0xee   : > { %v500_v10 = vstv %s499_s11 }
  0xef   : > { %v463_v1 = vadd.f32 %v462_v62, %v456_v61  ;;  %760 = vrcp.f32 %v500_v10 }
  0xf1   : > { %v464_v3 = vadd.f32 %v463_v1, %v457_v0 }
  0xf3   : > { %v465_v5 = vadd.f32 %v464_v3, %v458_v2 }
  0xf5   : > { %v466_v8 = vadd.f32 %v465_v5, %v459_v4 }
  0xf7   : > { %v467_v9 = vadd.f32 %v466_v8, %v460_v7 }
  0xf9   : > { %v468_v11 = vrot.slane %v467_v9, 4  ;;  %v761_v17 = vpop.eup %760 }
  0xfb   : > { %v469_v12 = vadd.f32 %v468_v11, %v467_v9 }
  0xfd   : > { %v470_v13 = vrot.slane %v469_v12, 2 }
  0xff   : > { %v471_v14 = vadd.f32 %v470_v13, %v469_v12 }
 0x101   : > { %v472_v15 = vrot.slane %v471_v14, 1 }
 0x103   : > { %v473_v16 = vadd.f32 %v472_v15, %v471_v14 }
 0x105   : > { %v502_v18 = vmul.f32 %v761_v17, %v473_v16 }
 0x107   : > { %v503_v19 = vsub.f32 %v334_v47, %v502_v18  ;;  %v504_v20 = vsub.f32 %v337_v53, %v502_v18  ;;  %v505_v21 = vsub.f32 %v725_v45, %v502_v18  ;;  %v506_v22 = vsub.f32 %v726_v49, %v502_v18 }
 0x108   : > { %v507_v23 = vsub.f32 %v350_v48, %v502_v18  ;;  %v508_v24 = vsub.f32 %v353_v54, %v502_v18  ;;  %v509_v25 = vsub.f32 %v845_v46, %v502_v18  ;;  %v510_v26 = vsub.f32 %v852_v50, %v502_v18 }
 0x109   : > { %v511_v27 = vmul.f32 %v503_v19, %v416_v44  ;;  %v512_v28 = vmul.f32 %v504_v20, %v421_v39  ;;  %v513_v29 = vmul.f32 %v505_v21, %v426_v40  ;;  %v514_v30 = vmul.f32 %v506_v22, %v431_v41 }
 0x10a   : > { %v515_v33 = vmul.f32 %v507_v23, %v841_v42  ;;  %v516_v36 = vmul.f32 %v508_v24, %v843_v43  ;;  %v517_v45 = vmul.f32 %v509_v25, %v446_v63  ;;  %v518_v48 = vmul.f32 %v510_v26, %v451_v6 }
 0x10b   : > { %v519_v31 = vmul.f32 %v511_v27, %v511_v27  ;;  %v520_v32 = vmul.f32 %v512_v28, %v512_v28  ;;  %v521_v34 = vmul.f32 %v513_v29, %v513_v29  ;;  %v522_v37 = vmul.f32 %v514_v30, %v514_v30 }
 0x10c   : > { %v523_v46 = vmul.f32 %v515_v33, %v515_v33  ;;  %v524_v44 = vmul.f32 %v516_v36, %v516_v36  ;;  %v525_v40 = vmul.f32 %v517_v45, %v517_v45  ;;  %v526_v49 = vmul.f32 %v518_v48, %v518_v48 }
 0x10d   : > { %v527_v35 = vadd.f32 %v520_v32, %v519_v31  ;;  %v541_v54 = vshrl.u32 %v540_v52, 7 }
 0x10f   : > { %v528_v38 = vadd.f32 %v527_v35, %v521_v34  ;;  %vm543_vm3 = vcmp.eq.s32.totalorder %v541_v54, 1  ;;  %vm542_vm4 = vcmp.eq.s32.totalorder %v541_v54, 0 }
 0x111   : > { %v529_v47 = vadd.f32 %v528_v38, %v522_v37 }
 0x113   : > { %v530_v39 = vadd.f32 %v529_v47, %v523_v46 }
 0x115   : > { %v531_v41 = vadd.f32 %v530_v39, %v524_v44 }
 0x117   : > { %v532_v50 = vadd.f32 %v531_v41, %v525_v40 }
 0x119   : > { %v533_v51 = vadd.f32 %v532_v50, %v526_v49 }
 0x11b   : > { %v534_v42 = vrot.slane %v533_v51, 4 }
 0x11d   : > { %v535_v53 = vadd.f32 %v534_v42, %v533_v51 }
 0x11f   : > { %v536_v43 = vrot.slane %v535_v53, 2 }
 0x121   : > { %v537_v55 = vadd.f32 %v536_v43, %v535_v53 }
 0x123   : > { %v538_v56 = vrot.slane %v537_v55, 1 }
 0x125   : > { %v539_v57 = vadd.f32 %v538_v56, %v537_v55 }
 0x127   : > { %v544_v58 = vsel %vm543_vm3, %v539_v57, 0.0 }
 0x128   : > { %v545_v59 = vsel %vm542_vm4, %v473_v16, %v544_v58 }
 0x129   : > { %546 = vst [vmem:[%s233_s17] sm:$0xff] %v545_v59 }
 0x12a PF: > { %s15_s15 = sadd.s32 1, %s768_s15  }
 0x12b   : > { %p12_p5 = scmp.ge.s32.totalorder %s15_s15, 4  }
 0x12d   :  { %14 = sbr.rel (!%p12_p5) target bundleno = 1 (0x1), region = 77 }

// kernel: residual_block_forward.7
= control target key start
LH: loop header
LB: loop body
LE: loop exit
PB: predicated region body
PF: predicated region fallthrough
CT: control target
= control target key end

     0   :  { %s373_s12 = smov 0   ;;  %s419_s0 = inlined_call_operand.vmem [shape: bf16[2,80,128], index: 0, kind: input, shape index: {}]   ;;  %s420_s1 = inlined_call_operand.vmem [shape: f32[1,128], index: 1, kind: input, shape index: {}]   ;;  %s421_s2 = inlined_call_operand.vmem [shape: f32[1,128], index: 2, kind: input, shape index: {}]   ;;  %s422_s3 = inlined_call_operand.vmem [shape: f32[2,80,128], index: 3, kind: output, shape index: {}]  }
   0x1 LB: > { %s300_s13 = sadd.s32 4294967295, %s351_s12   ;;  %p304_p0 = scmp.ge.s32.totalorder %s351_s12, 1  ;;  %s351_s12 = sphi %s373_s12, %s13_s12  }
   0x2   : > { %p137_p1 = scmp.lt.s32.totalorder %s351_s12, 3 }
   0x4   : > { %p138_p2 = pnand %p304_p0, %p137_p1 }
   0x5   : > { %p161_p3 = scmp.lt.s32.totalorder (!%p138_p2), %s300_s13, 1  ;;  %v307_v0 = vld [vmem:[%s420_s1] ss:$0 sm:$0xff] (!%p138_p2) }
   0x6   : > { %141 = sbr.rel (%p138_p2) target bundleno = 35 (0x23), region = 32  ;;  %v308_v9 = vld [vmem:[%s421_s2] ss:$0 sm:$0xff] (!%p138_p2) }
   0xd   : > { %s424_s13 = smov (!%p161_p3, %s300_s13), 1 }
   0xe   : > { %s335_s14 = smul.u32 40, %s424_s13 }
   0xf   : > { %s336_s20 = smul.u32 80, %s424_s13 }
  0x10   : > { %s387_s17 = scalar_lea.vmem %s419_s0, %s335_s14 }
  0x11   : > { %v312_v1 = vld [vmem:[%s387_s17] sm:$0xff]   ;;  %v331_v2 = vld [vmem:[%s387_s17 + $0x8] sm:$0xff]   ;;  %v332_v3 = vld [vmem:[%s387_s17 + $0x10] sm:$0xff]   ;;  %s403_s25 = scalar_lea.vmem %s422_s3, %s336_s20 }
  0x12   : > { %v313_v4 = vunpack.c.l.bf16 %v312_v1  ;;  %v314_v5 = vunpack.c.h.bf16 %v312_v1  ;;  %v317_v6 = vunpack.c.l.bf16 %v331_v2  ;;  %v318_v7 = vunpack.c.h.bf16 %v331_v2  ;;  %v333_v8 = vld [vmem:[%s387_s17 + $0x18] sm:$0xff]   ;;  %v334_v30 = vld [vmem:[%s387_s17 + $0x20] sm:$0xff]  }
  0x13   : > { %v321_v10 = vunpack.c.l.bf16 %v332_v3  ;;  %v322_v11 = vunpack.c.h.bf16 %v332_v3  ;;  %v325_v12 = vunpack.c.l.bf16 %v333_v8  ;;  %v326_v13 = vunpack.c.h.bf16 %v333_v8 }
  0x14   : > { %v198_v14 = vmul.f32 %v313_v4, %v307_v0  ;;  %v199_v15 = vmul.f32 %v314_v5, %v307_v0  ;;  %v200_v16 = vmul.f32 %v317_v6, %v307_v0  ;;  %v201_v17 = vmul.f32 %v318_v7, %v307_v0 }
  0x15   : > { %v202_v18 = vmul.f32 %v321_v10, %v307_v0  ;;  %v203_v19 = vmul.f32 %v322_v11, %v307_v0  ;;  %v204_v20 = vmul.f32 %v325_v12, %v307_v0  ;;  %v205_v21 = vmul.f32 %v326_v13, %v307_v0 }
  0x16   : > { %v215_v22 = vadd.f32 %v308_v9, %v198_v14  ;;  %v216_v23 = vadd.f32 %v308_v9, %v199_v15  ;;  %v217_v24 = vadd.f32 %v308_v9, %v200_v16  ;;  %v218_v25 = vadd.f32 %v308_v9, %v201_v17 }
  0x17   : > { %v219_v26 = vadd.f32 %v308_v9, %v202_v18  ;;  %v220_v27 = vadd.f32 %v308_v9, %v203_v19  ;;  %v221_v28 = vadd.f32 %v308_v9, %v204_v20  ;;  %v222_v29 = vadd.f32 %v308_v9, %v205_v21 }
  0x18   : > { %v225_v31 = vmax.f32 %v215_v22, 0.0  ;;  %v226_v32 = vmax.f32 %v216_v23, 0.0  ;;  %v227_v33 = vmax.f32 %v217_v24, 0.0  ;;  %v228_v34 = vmax.f32 %v218_v25, 0.0 }
  0x19   : > { %v229_v35 = vmax.f32 %v219_v26, 0.0  ;;  %v230_v36 = vmax.f32 %v220_v27, 0.0  ;;  %v231_v37 = vmax.f32 %v221_v28, 0.0  ;;  %v232_v38 = vmax.f32 %v222_v29, 0.0 }
  0x1a   : > { %235 = vst [vmem:[%s403_s25] sm:$0xff] %v225_v31  ;;  %236 = vst [vmem:[%s403_s25 + $0x8] sm:$0xff] %v226_v32  ;;  %v329_v39 = vunpack.c.l.bf16 %v334_v30  ;;  %v330_v40 = vunpack.c.h.bf16 %v334_v30 }
  0x1b   : > { %237 = vst [vmem:[%s403_s25 + $0x10] sm:$0xff] %v227_v33  ;;  %238 = vst [vmem:[%s403_s25 + $0x18] sm:$0xff] %v228_v34 }
  0x1c   : > { %239 = vst [vmem:[%s403_s25 + $0x20] sm:$0xff] %v229_v35  ;;  %240 = vst [vmem:[%s403_s25 + $0x28] sm:$0xff] %v230_v36  ;;  %v206_v41 = vmul.f32 %v329_v39, %v307_v0  ;;  %v207_v42 = vmul.f32 %v330_v40, %v307_v0 }
  0x1d   : > { %241 = vst [vmem:[%s403_s25 + $0x30] sm:$0xff] %v231_v37  ;;  %242 = vst [vmem:[%s403_s25 + $0x38] sm:$0xff] %v232_v38 }
  0x1e   : > { %v223_v43 = vadd.f32 %v308_v9, %v206_v41  ;;  %v224_v44 = vadd.f32 %v308_v9, %v207_v42 }
  0x20   : > { %v233_v45 = vmax.f32 %v223_v43, 0.0  ;;  %v234_v46 = vmax.f32 %v224_v44, 0.0 }
  0x22   : > { %243 = vst [vmem:[%s403_s25 + $0x40] sm:$0xff] %v233_v45  ;;  %244 = vst [vmem:[%s403_s25 + $0x48] sm:$0xff] %v234_v46 }
  0x23 PF: > { %s13_s12 = sadd.s32 1, %s351_s12  }
  0x24   : > { %p10_p4 = scmp.ge.s32.totalorder %s13_s12, 4  }
  0x26   :  { %12 = sbr.rel (!%p10_p4) target bundleno = 1 (0x1), region = 62 }

// kernel: residual_block_forward.6
= control target key start
LH: loop header
LB: loop body
LE: loop exit
PB: predicated region body
PF: predicated region fallthrough
CT: control target
= control target key end

     0   :  { %s3412_s21 = smov 0   ;;  %s4204_s0 = inlined_call_operand.vmem [shape: bf16[2,110,128], index: 0, kind: input, shape index: {}]   ;;  %s4205_s1 = inlined_call_operand.vmem [shape: bf16[1152,128], index: 1, kind: input, shape index: {}]   ;;  %s4206_s2 = inlined_call_operand.vmem [shape: f32[80,1], index: 2, kind: input, shape index: {}]   ;;  %s4207_s3 = inlined_call_operand.vmem [shape: bf16[2,80,4], index: 3, kind: input, shape index: {}]   ;;  %s4208_s4 = inlined_call_operand.vmem [shape: bf16[4,128], index: 4, kind: input, shape index: {}]   ;;  %s4209_s5 = inlined_call_operand.vmem [shape: bf16[2,80,128], index: 5, kind: output, shape index: {0}]   ;;  %s4210_s6 = inlined_call_operand.vmem [shape: f32[16,128], index: 6, kind: output, shape index: {1}]  }
   0x1 LB: > { %s2437_s22 = sadd.s32 4294967295, %s3371_s21   ;;  %p2441_p0 = scmp.ge.s32.totalorder %s3371_s21, 1  ;;  %s3371_s21 = sphi %s3412_s21, %s17_s21  }
   0x2   : > { %p225_p1 = scmp.lt.s32.totalorder %s3371_s21, 3 }
   0x4   : > { %p226_p2 = pnand %p2441_p0, %p225_p1 }
   0x5   : > { %v3259_v0 = vld [vmem:[%s4205_s1 + $0x40] sm:$0xff] (!%p226_p2)   ;;  %v3373_v1 = vmov (!%p226_p2), 0.0   ;;  %v3261_v3 = vld [vmem:[%s4205_s1 + $0x48] sm:$0xff] (!%p226_p2)   ;;  %vm3374_vm0 = vmmov (!%p226_p2), 0   ;;  %p264_p3 = scmp.lt.s32.totalorder (!%p226_p2), %s2437_s22, 1  ;;  %v3263_v5 = vld [vmem:[%s4205_s1 + $0x50] sm:$0xff] (!%p226_p2)  }
   0x6   : > { %229 = sbr.rel (%p226_p2) target bundleno = 504 (0x1f8), region = 40  ;;  %2725 = vmatprep.subr.bf16.mxu1 (!%p226_p2), %v3373_v1  ;;  %2905 = vmatprep.subr.bf16.mxu0 (!%p226_p2), %v3373_v1  ;;  %v3260_v2 = vld [vmem:[%s4205_s1 + $0x140] sm:$0xff] (!%p226_p2)   ;;  %v3262_v4 = vld [vmem:[%s4205_s1 + $0x148] sm:$0xff] (!%p226_p2)   ;;  %v3264_v6 = vld [vmem:[%s4205_s1 + $0x150] sm:$0xff] (!%p226_p2)   ;;  %vm355_vm1 = vsmask.f32 (!%p226_p2), 7424 }
   0x7   : > { %2726 = vmatpush3.bf16.msra.mxu1 (!%p226_p2), %v3259_v0  ;;  %2741 = vmatprep.mubr.msk.bf16.mxu1 (!%p226_p2), %vm3374_vm0, %v3373_v1  ;;  %v3265_v7 = vld [vmem:[%s4205_s1 + $0x58] sm:$0xff] (!%p226_p2)   ;;  %v3267_v9 = vld [vmem:[%s4205_s1 + $0x60] sm:$0xff] (!%p226_p2)   ;;  %v3269_v15 = vld [vmem:[%s4205_s1 + $0x68] sm:$0xff] (!%p226_p2)   ;;  %vm1252_vm2 = vcmask (!%p226_p2), 1045504   ;;  %vm672_vm3 = vcmask (!%p226_p2), 1046528   ;;  %vm1832_vm4 = vcmask (!%p226_p2), 1044480  }
   0x8   : > { %2906 = vmatpush3.bf16.msra.mxu0 (!%p226_p2), %v3260_v2  ;;  %2727 = vmatprep.subr.bf16.mxu1 (!%p226_p2), %v3373_v1  ;;  %v3266_v8 = vld [vmem:[%s4205_s1 + $0x158] sm:$0xff] (!%p226_p2)   ;;  %v3268_v10 = vld [vmem:[%s4205_s1 + $0x160] sm:$0xff] (!%p226_p2)   ;;  %v3270_v16 = vld [vmem:[%s4205_s1 + $0x168] sm:$0xff] (!%p226_p2)   ;;  %vm2254_vm5 = vcmask (!%p226_p2), 7168   ;;  %vm1042_vm6 = vsmask.f32 (!%p226_p2), 6400 }
   0x9   : > { %2907 = vmatprep.subr.bf16.mxu0 (!%p226_p2), %v3373_v1  ;;  %2921 = vmatprep.mubr.msk.bf16.mxu0 (!%p226_p2), %vm3374_vm0, %v3373_v1  ;;  %v3271_v19 = vld [vmem:[%s4205_s1 + $0x70] sm:$0xff] (!%p226_p2)   ;;  %v3273_v27 = vld [vmem:[%s4205_s1 + $0x78] sm:$0xff] (!%p226_p2)   ;;  %v3280_v34 = vld [vmem:[%s4205_s1] sm:$0xff] (!%p226_p2)   ;;  %vm1622_vm7 = vsmask.f32 (!%p226_p2), 5376  ;;  %vm2032_vm8 = vcmask (!%p226_p2), 1041408  }
   0xa   : > { %v3272_v22 = vld [vmem:[%s4205_s1 + $0x170] sm:$0xff] (!%p226_p2)   ;;  %v3274_v29 = vld [vmem:[%s4205_s1 + $0x178] sm:$0xff] (!%p226_p2)   ;;  %v3281_v35 = vld [vmem:[%s4205_s1 + $0x180] sm:$0xff] (!%p226_p2)   ;;  %vm2016_vm9 = vcmask (!%p226_p2), 31744   ;;  %s3376_s13 = smov (!%p226_p2), 1.0  }
   0xb   : > { %2728 = vmatpush3.bf16.msra.mxu1 (!%p226_p2), %v3261_v3  ;;  %v3282_v41 = vld [vmem:[%s4205_s1 + $0x8] sm:$0xff] (!%p226_p2)   ;;  %v3286_v49 = vld [vmem:[%s4205_s1 + $0x10] sm:$0xff] (!%p226_p2)   ;;  %v3289_v57 = vld [vmem:[%s4205_s1 + $0x18] sm:$0xff] (!%p226_p2)  }
   0xc   : > { %2908 = vmatpush3.bf16.msra.mxu0 (!%p226_p2), %v3262_v4  ;;  %2729 = vmatprep.subr.bf16.mxu1 (!%p226_p2), %v3373_v1  ;;  %v3283_v42 = vld [vmem:[%s4205_s1 + $0x188] sm:$0xff] (!%p226_p2)   ;;  %v3287_v50 = vld [vmem:[%s4205_s1 + $0x190] sm:$0xff] (!%p226_p2)   ;;  %v3291_v62 = vld [vmem:[%s4205_s1 + $0x198] sm:$0xff] (!%p226_p2)  }
   0xd   : > { %s4212_s22 = smov (!%p264_p3, %s2437_s22), 1  ;;  %2909 = vmatprep.subr.bf16.mxu0 %v3373_v1  ;;  %v3292_v63 = vld [vmem:[%s4205_s1 + $0x20] sm:$0xff]  }
   0xe   : > { %s3241_s11 = smul.u32 56, %s4212_s22  ;;  %v3293_v3 = vld [vmem:[%s4205_s1 + $0x1a0] sm:$0xff]   ;;  %s2445_s15 = sshll.u32 %s4212_s22, 3 }
   0xf   : > { %2730 = vmatpush3.bf16.msra.mxu1 %v3263_v5  ;;  %s3242_s30 = smul.u32 40, %s4212_s22  ;;  %s282_s19 = scalar_lea.vmem %s4210_s6, %s2445_s15 }
  0x10   : > { %2910 = vmatpush3.bf16.msra.mxu0 %v3264_v6  ;;  %2731 = vmatprep.subr.bf16.mxu1 %v3373_v1  ;;  %s3462_s18 = scalar_lea.vmem %s4204_s0, %s3241_s11 }
  0x11   : > { %2911 = vmatprep.subr.bf16.mxu0 %v3373_v1  ;;  %v284_v11 = vld [vmem:[%s3462_s18] sm:$0xf]  ;;  %v3474_v12 = vld [vmem:[%s3462_s18 + $0x4] sm:$0xf]  ;;  %v3480_v14 = vld [vmem:[%s3462_s18 + $0x8] sm:$0xff]   ;;  %s3786_s11 = scalar_lea.vmem %s4207_s3, %s3242_s30  ;;  %s4144_s12 = scalar_lea.vmem %s4209_s5, %s3242_s30 }
  0x12   : > { %v3477_v13 = vcombine.low %v284_v11, %v3474_v12  ;;  %v821_v18 = vld [vmem:[%s3462_s18 + $0x8] sm:$0xf]  ;;  %v1232_v21 = vld [vmem:[%s3462_s18 + $0x4] sm:$0xc]  ;;  %v364_v24 = vshll.u32 %v3480_v14, 16  ;;  %v3278_v25 = vld [vmem:[%s3462_s18 + $0xc] sm:$0xff]  }
  0x13   : > { %2732 = vmatpush3.bf16.msra.mxu1 %v3265_v7  ;;  %v2500_v26 = vcombine.low %v1232_v21, %v821_v18  ;;  %v3508_v28 = vld [vmem:[%s3462_s18 + $0x10] sm:$0xff]   ;;  %v1254_v33 = vrot.slane %v3278_v25, 2  ;;  %v368_v36 = vshrl.u32 %v3480_v14, 16  ;;  %v3535_v44 = vld [vmem:[%s3462_s18 + $0x18] sm:$0xff]   ;;  %v674_v45 = vrot.slane %v3480_v14, 1  ;;  %v3571_v60 = vld [vmem:[%s3462_s18 + $0x20] sm:$0xff]  }
  0x14   : > { %2912 = vmatpush3.bf16.msra.mxu0 %v3266_v8  ;;  %2733 = vmatprep.subr.bf16.mxu1 %v3373_v1  ;;  %v359_v17 = vshll.u32 %v3477_v13, 16  ;;  %v357_v20 = vshrl.u32 %v3477_v13, 16  ;;  %v366_v31 = vrot.slane %v364_v24, 1  ;;  %v372_v37 = vshll.u32 %v3508_v28, 16  ;;  %v3285_v40 = vld [vmem:[%s3462_s18 + $0x14] sm:$0xff]   ;;  %v3564_v56 = vld [vmem:[%s3462_s18 + $0x1c] sm:$0xff]  }
  0x15   : > { %2913 = vmatprep.subr.bf16.mxu0 %v3373_v1  ;;  %v1253_v32 = vrot.slane %v2500_v26, 2  ;;  %v1256_v47 = vrot.slane %v3285_v40, 2  ;;  %v676_v48 = vrot.slane %v3508_v28, 1  ;;  %v376_v53 = vshrl.u32 %v3508_v28, 16  ;;  %v3595_v6 = vld [vmem:[%s3462_s18 + $0x24] sm:$0xff]   ;;  %v3298_v21 = vld [vmem:[%s4205_s1 + $0x30] sm:$0xff]  }
  0x16   : > { %v361_v23 = vrot.slane %v359_v17, 1  ;;  %v374_v43 = vrot.slane %v372_v37, 1  ;;  %v370_v46 = vor.u32 %v368_v36, %v366_v31  ;;  %v380_v54 = vshll.u32 %v3535_v44, 16  ;;  %v3599_v7 = vld [vmem:[%s3462_s18 + $0x28] ss:$0 sps:$4 sm:$0x11]  }
  0x17   : > { %2734 = vmatpush3.bf16.msra.mxu1 %v3267_v9  ;;  %v1255_v39 = vsel %vm1252_vm2, %v1253_v32, %v1254_v33  ;;  %v3556_v51 = vsel %vm672_vm3, %v674_v45, %v676_v48  ;;  %v1257_v55 = vsel %vm1252_vm2, %v1254_v33, %v1256_v47  ;;  %v1258_v61 = vrot.slane %v3564_v56, 2  ;;  %v3302_v24 = vld [vmem:[%s4205_s1 + $0x38] sm:$0xff]   ;;  %v3306_v40 = vld [vmem:[%s4205_s1 + $0x80] sm:$0xff]  }
  0x18   : > { %2914 = vmatpush3.bf16.msra.mxu0 %v3268_v10  ;;  %2735 = vmatprep.subr.bf16.mxu1 %v3373_v1  ;;  %v362_v30 = vor.u32 %v361_v23, %v357_v20  ;;  %v375_v52 = vsel %vm355_vm1, %v370_v46, %v374_v43  ;;  %v378_v58 = vor.u32 %v376_v53, %v374_v43  ;;  %v382_v59 = vrot.slane %v380_v54, 1  ;;  %v3296_v10 = vld [vmem:[%s4205_s1 + $0x28] sm:$0xff]   ;;  %v3674_v43 = vld [vmem:[%s3462_s18 + $0x18] sm:$0xff]  }
  0x19   : > { %2915 = vmatprep.subr.bf16.mxu0 %v3373_v1  ;;  %v384_v0 = vshrl.u32 %v3535_v44, 16  ;;  %v388_v4 = vshll.u32 %v3571_v60, 16  ;;  %v1259_v5 = vsel %vm1252_vm2, %v1256_v47, %v1258_v61  ;;  %v1260_v11 = vrot.slane %v3595_v6, 2  ;;  %v3308_v46 = vld [vmem:[%s4205_s1 + $0x88] sm:$0xff]   ;;  %v3313_v53 = vld [vmem:[%s4205_s1 + $0x98] sm:$0xff]  }
  0x1a   : > { %v367_v38 = vsel %vm355_vm1, %v362_v30, %v366_v31  ;;  %v383_v2 = vsel %vm355_vm1, %v378_v58, %v382_v59  ;;  %v392_v18 = vshrl.u32 %v3571_v60, 16  ;;  %v1401_v30 = vld [vmem:[%s3462_s18 + $0xc] sm:$0xf]  ;;  %v1458_v47 = vrot.slane %v3674_v43, 2 }
  0x1b   : > { %2736 = vmatpush3.bf16.msra.mxu1 %v3269_v15  ;;  %v386_v8 = vor.u32 %v384_v0, %v382_v59  ;;  %v390_v9 = vrot.slane %v388_v4, 1  ;;  %v3297_v15 = vld [vmem:[%s4205_s1 + $0x1a8] sm:$0xff]   ;;  %v1261_v20 = vsel %vm1252_vm2, %v1258_v61, %v1260_v11 }
  0x1c   : > { %2916 = vmatpush3.bf16.msra.mxu0 %v3270_v16  ;;  %2737 = vmatprep.subr.bf16.mxu1 %v3373_v1  ;;  %v3611_v16 = vld [vmem:[%s3462_s18 + $0x2c] ss:$0 sps:$4 sm:$0x33]  }
  0x1d   : > { %2917 = vmatprep.subr.bf16.mxu0 %v3373_v1  ;;  %v391_v17 = vsel %vm355_vm1, %v386_v8, %v390_v9  ;;  %v1262_v23 = vrot.slane %v3611_v16, 2  ;;  %v394_v25 = vor.u32 %v392_v18, %v390_v9  ;;  %v3722_v61 = vld [vmem:[%s3462_s18 + $0x28] sm:$0xff]  }
  0x1e   : > { %v1462_v9 = vrot.slane %v3722_v61, 2  ;;  %v3320_v18 = vld [vmem:[%s4205_s1 + $0x1e8] sm:$0xff]  }
  0x1f   : > { %2738 = vmatpush3.bf16.msra.mxu1 %v3271_v19  ;;  %v396_v19 = vshll.u32 %v3599_v7, 16  ;;  %v1263_v32 = vsel %vm1252_vm2, %v1260_v11, %v1262_v23  ;;  %v882_v11 = vrot.slane %v3595_v6, 1 }
  0x20   : > { %2918 = vmatpush3.bf16.msra.mxu0 %v3272_v22  ;;  %2739 = vmatprep.subr.bf16.mxu1 %v3373_v1  ;;  %v3299_v22 = vld [vmem:[%s4205_s1 + $0x1b0] sm:$0xff]  }
  0x21   : > { %2919 = vmatprep.subr.bf16.mxu0 %v3373_v1  ;;  %v398_v26 = vrot.slane %v396_v19, 1 }
  0x23   : > { %2740 = vmatpush3.bf16.msra.mxu1 %v3273_v27  ;;  %v3303_v27 = vld [vmem:[%s4205_s1 + $0x1b8] sm:$0xff]   ;;  %v399_v31 = vsel %vm355_vm1, %v394_v25, %v398_v26  ;;  %v3321_v26 = vld [vmem:[%s4205_s1 + $0xb0] sm:$0xff]  }
  0x24   : > { %2920 = vmatpush3.bf16.msra.mxu0 %v3274_v29  ;;  %2761 = vmatprep.subr.bf16.mxu1 %v3373_v1  ;;  %v1400_v29 = vld [vmem:[%s3462_s18 + $0x8] sm:$0xc] }
  0x25   : > { %2941 = vmatprep.subr.bf16.mxu0 %v3373_v1  ;;  %v3646_v33 = vcombine.low %v1400_v29, %v1401_v30 }
  0x26   : > { %2742 = vmatmul.mubr.bf16.vlgmr.msra.gmra.mrb[0].mxu1 %v367_v38 }
  0x27   : > { %2922 = vmatmul.mubr.bf16.vlgmr.msra.gmra.mrb[0].mxu0 %v1255_v39  ;;  %2762 = vmatpush3.bf16.msra.mxu1 %v3280_v34  ;;  %v3649_v34 = vld [vmem:[%s3462_s18 + $0x10] sm:$0xff]   ;;  %v1455_v37 = vrot.slane %v3646_v33, 2 }
  0x28   : > { %2942 = vmatpush3.bf16.msra.mxu0 %v3281_v35  ;;  %2763 = vmatprep.subr.bf16.mxu1 %v3373_v1  ;;  %v652_v35 = vld [vmem:[%s3462_s18] sm:$0xe]  ;;  %v1456_v38 = vrot.slane %v3649_v34, 2  ;;  %v1834_v59 = vrot.slane %v3649_v34, 3 }
  0x29   : > { %2943 = vmatprep.subr.bf16.mxu0 %v3373_v1  ;;  %2745 = vmatprep.mubr.msk.bf16.mxu1 %vm3374_vm0, %v3373_v1  ;;  %v2468_v36 = vcombine.low %v652_v35, %v3474_v12  ;;  %v3324_v35 = vld [vmem:[%s4205_s1 + $0xb8] sm:$0xff]  }
  0x2a   : > { %2925 = vmatprep.mubr.msk.bf16.mxu0 %vm3374_vm0, %v3373_v1 }
  0x2b   : > { %2764 = vmatpush3.bf16.msra.mxu1 %v3282_v41  ;;  %v673_v39 = vrot.slane %v2468_v36, 1  ;;  %v3307_v41 = vld [vmem:[%s4205_s1 + $0x1c0] sm:$0xff]  }
  0x2c   : > { %2944 = vmatpush3.bf16.msra.mxu0 %v3283_v42  ;;  %2765 = vmatprep.subr.bf16.mxu1 %v3373_v1  ;;  %v1457_v42 = vsel %vm1252_vm2, %v1455_v37, %v1456_v38 }
  0x2d   : > { %2945 = vmatprep.subr.bf16.mxu0 %v3373_v1  ;;  %v3670_v12 = vsel %vm672_vm3, %v673_v39, %v674_v45  ;;  %v3309_v45 = vld [vmem:[%s4205_s1 + $0x1c8] sm:$0xff]   ;;  %v1082_v39 = vshll.u32 %v3595_v6, 16 }
  0x2e   : > { %2746 = vmatmul.mubr.bf16.gmra.mrb[4].mxu1 %v375_v52  ;;  %v3312_v52 = vld [vmem:[%s4205_s1 + $0x1d0] sm:$0xff]  }
  0x2f   : > { %2926 = vmatmul.mubr.bf16.gmra.mrb[4].mxu0 %v1257_v55  ;;  %2766 = vmatpush3.bf16.msra.mxu1 %v3286_v49  ;;  %v3694_v49 = vld [vmem:[%s3462_s18 + $0x20] sm:$0xff]   ;;  %v3315_v55 = vld [vmem:[%s4205_s1 + $0x1d8] sm:$0xff]  }
  0x30   : > { %2946 = vmatpush3.bf16.msra.mxu0 %v3287_v50  ;;  %2749 = vmatprep.mubr.msk.bf16.mxu1 %vm3374_vm0, %v3373_v1  ;;  %v1459_v50 = vsel %vm1252_vm2, %v1456_v38, %v1458_v47  ;;  %v1460_v54 = vrot.slane %v3694_v49, 2  ;;  %v1838_v8 = vrot.slane %v3694_v49, 3  ;;  %v3325_v38 = vld [vmem:[%s4205_s1 + $0x1f8] sm:$0xff]  }
  0x31   : > { %2767 = vmatprep.subr.bf16.mxu1 %v3373_v1  ;;  %2929 = vmatprep.mubr.msk.bf16.mxu0 %vm3374_vm0, %v3373_v1 }
  0x32   : > { %2947 = vmatprep.subr.bf16.mxu0 %v3373_v1  ;;  %v1461_v0 = vsel %vm1252_vm2, %v1458_v47, %v1460_v54  ;;  %v1463_v25 = vsel %vm1252_vm2, %v1460_v54, %v1462_v9  ;;  %v3828_v54 = vld [vmem:[%s4206_s2 + $0x18] sm:$0xff] }
  0x33   : > { %2768 = vmatpush3.bf16.msra.mxu1 %v3289_v57  ;;  %v1812_v57 = vld [vmem:[%s3462_s18 + $0x8] sm:$0x8] }
  0x34   : > { %2948 = vmatpush3.bf16.msra.mxu0 %v3291_v62  ;;  %2769 = vmatprep.subr.bf16.mxu1 %v3373_v1  ;;  %v2532_v58 = vcombine.low %v1812_v57, %v1401_v30  ;;  %v3322_v30 = vld [vmem:[%s4205_s1 + $0x1f0] sm:$0xff]  }
  0x35   : > { %2949 = vmatprep.subr.bf16.mxu0 %v3373_v1 }
  0x36   : > { %2750 = vmatmul.mubr.bf16.gmra.mrb[8].mxu1 %v383_v2  ;;  %v1833_v62 = vrot.slane %v2532_v58, 3  ;;  %v3317_v2 = vld [vmem:[%s4205_s1 + $0x1e0] sm:$0xff]  }
  0x37   : > { %2930 = vmatmul.mubr.bf16.gmra.mrb[8].mxu0 %v1259_v5  ;;  %2770 = vmatpush3.bf16.msra.mxu1 %v3292_v63  ;;  %v1836_v63 = vrot.slane %v3674_v43, 3 }
  0x38   : > { %2950 = vmatpush3.bf16.msra.mxu0 %v3293_v3  ;;  %2753 = vmatprep.mubr.msk.bf16.mxu1 %vm3374_vm0, %v3373_v1  ;;  %v3319_v3 = vld [vmem:[%s4205_s1 + $0xa8] sm:$0xff]   ;;  %v3735_v4 = vsel %vm1832_vm4, %v1833_v62, %v1834_v59  ;;  %v3842_v62 = vld [vmem:[%s4206_s2 + $0x20] sm:$0xff] }
  0x39   : > { %2933 = vmatprep.mubr.msk.bf16.mxu0 %vm3374_vm0, %v3373_v1  ;;  %2771 = vmatprep.subr.bf16.mxu1 %v3373_v1  ;;  %v3738_v5 = vsel %vm1832_vm4, %v1834_v59, %v1836_v63  ;;  %v1641_v59 = vshrl.u32 %v3674_v43, 16 }
  0x3a   : > { %2951 = vmatprep.subr.bf16.mxu0 %v3373_v1 }
  0x3b   : > { %2772 = vmatpush3.bf16.msra.mxu1 %v3296_v10  ;;  %v880_v10 = vrot.slane %v3564_v56, 1  ;;  %v3351_v56 = vld [vmem:[%s4205_s1 + $0x130] sm:$0xff]  }
  0x3c   : > { %2952 = vmatpush3.bf16.msra.mxu0 %v3297_v15  ;;  %2773 = vmatprep.subr.bf16.mxu1 %v3373_v1  ;;  %v1840_v15 = vrot.slane %v3722_v61, 3 }
  0x3d   : > { %2953 = vmatprep.subr.bf16.mxu0 %v3373_v1  ;;  %v3757_v19 = vsel %vm672_vm3, %v880_v10, %v882_v11 }
  0x3e   : > { %2754 = vmatmul.mubr.bf16.gmra.mrb[12].mxu1 %v391_v17  ;;  %v3747_v17 = vsel %vm1832_vm4, %v1836_v63, %v1838_v8 }
  0x3f   : > { %2934 = vmatmul.mubr.bf16.gmra.mrb[12].mxu0 %v1261_v20  ;;  %2757 = vmatprep.mubr.msk.bf16.mxu1 %vm3374_vm0, %v3373_v1  ;;  %v3762_v20 = vsel %vm1832_vm4, %v1838_v8, %v1840_v15  ;;  %v2260_v8 = vsel %vm2254_vm5, %v3828_v54, 0.0 }
  0x40   : > { %2774 = vmatpush3.bf16.msra.mxu1 %v3298_v21  ;;  %2937 = vmatprep.mubr.msk.bf16.mxu0 %vm3374_vm0, %v3373_v1  ;;  %v3352_v21 = vld [vmem:[%s3462_s18 + $0x2c] ss:$0 sps:$4 sm:$0x11]  }
  0x41   : > { %2954 = vmatpush3.bf16.msra.mxu0 %v3299_v22  ;;  %2775 = vmatprep.subr.bf16.mxu1 %v3373_v1  ;;  %v1624_v22 = vshrl.u32 %v3646_v33, 16  ;;  %v884_v23 = vrot.slane %v3352_v21, 1 }
  0x42   : > { %2955 = vmatprep.subr.bf16.mxu0 %v3373_v1 }
  0x43   : > { %v3779_v29 = vsel %vm672_vm3, %v882_v11, %v884_v23  ;;  %v3856_v11 = vld [vmem:[%s4206_s2 + $0x28] sm:$0xff]  ;;  %v3375_v23 = vmov 0  }
  0x44   : > { %2776 = vmatpush3.bf16.msra.mxu1 %v3302_v24  ;;  %v1627_v24 = vshll.u32 %v3646_v33, 16  ;;  %v1635_v33 = vshll.u32 %v3649_v34, 16  ;;  %3258 = vset.pattern.permute.xlu1 %v3375_v23 }
  0x45   : > { %2956 = vmatpush3.bf16.msra.mxu0 %v3303_v27  ;;  %2797 = vmatprep.subr.bf16.mxu1 %v3373_v1  ;;  %v3323_v27 = vld [vmem:[%s3462_s18 + $0x30] ss:$0 sps:$4 sm:$0x33]  }
  0x46   : > { %2758 = vmatmul.mubr.bf16.gmra.mrb[16].mxu1 %v399_v31  ;;  %2977 = vmatprep.subr.bf16.mxu0 %v3373_v1  ;;  %v1632_v31 = vshrl.u32 %v3649_v34, 16  ;;  %v1629_v36 = vrot.slane %v1627_v24, 3  ;;  %v1464_v37 = vrot.slane %v3323_v27, 2  ;;  %v1079_v34 = vshrl.u32 %v3595_v6, 16  ;;  %v2121_v6 = vld [vmem:[%s4206_s2 + $0x10] sm:$0xff] }
  0x47   : > { %2938 = vmatmul.mubr.bf16.gmra.mrb[16].mxu0 %v1263_v32  ;;  %2777 = vmatprep.mubr.msk.bf16.mxu1 %vm3374_vm0, %v3373_v1  ;;  %v3794_v32 = vrot.slane %v1624_v22, 2  ;;  %v2262_v22 = vsel %vm2254_vm5, %v3842_v62, 0.0 }
  0x48   : > { %2957 = vmatprep.mubr.msk.bf16.mxu0 %vm3374_vm0, %v3373_v1  ;;  %v1081_v47 = vrot.slane %v1079_v34, 1  ;;  %3257 = vset.pattern.permute.xlu0 %v3375_v23  ;;  %v3329_v34 = vld [vmem:[%s4205_s1 + $0xc8] sm:$0xff]  }
  0x49   : > { %v1630_v58 = vor.u32 %v1629_v36, %v3794_v32  ;;  %v3338_v23 = vld [vmem:[%s4205_s1 + $0x228] sm:$0xff]  }
  0x4e   : > { %2778 = vmatmul.mubr.bf16.vlgmr.msra.gmra.mrb[0].mxu1 %v3477_v13  ;;  %v3311_v13 = vld [vmem:[%s4205_s1 + $0x90] sm:$0xff]  }
  0x4f   : > { %2958 = vmatmul.mubr.bf16.vlgmr.msra.gmra.mrb[0].mxu0 %v1457_v42  ;;  %2798 = vmatpush3.bf16.msra.mxu1 %v3306_v40  ;;  %v1634_v40 = vrot.slane %v1632_v31, 2  ;;  %v1637_v42 = vrot.slane %v1635_v33, 3  ;;  %v1643_v31 = vrot.slane %v1641_v59, 2  ;;  %v3881_v33 = vld [vmem:[%s4206_s2 + $0x38] sm:$0xff] }
  0x50   : > { %2978 = vmatpush3.bf16.msra.mxu0 %v3307_v41  ;;  %2799 = vmatprep.subr.bf16.mxu1 %v3373_v1  ;;  %v3813_v41 = vld [vmem:[%s4206_s2] sm:$0xff] }
  0x51   : > { %2979 = vmatprep.subr.bf16.mxu0 %v3373_v1  ;;  %2781 = vmatprep.mubr.msk.bf16.mxu1 %vm3374_vm0, %v3373_v1 }
  0x52   : > { %2961 = vmatprep.mubr.msk.bf16.mxu0 %vm3374_vm0, %v3373_v1 }
  0x53   : > { %2800 = vmatpush3.bf16.msra.mxu1 %v3308_v46  ;;  %v1088_v46 = vshrl.u32 %v3611_v16, 16 }
  0x54   : > { %2980 = vmatpush3.bf16.msra.mxu0 %v3309_v45  ;;  %2801 = vmatprep.subr.bf16.mxu1 %v3373_v1  ;;  %v2120_v45 = vld [vmem:[%s4206_s2 + $0x8] sm:$0xff] }
  0x55   : > { %2981 = vmatprep.subr.bf16.mxu0 %v3373_v1  ;;  %2136 = vperm.xlu1 %3258, %v2120_v45  }
  0x56   : > { %2782 = vmatmul.mubr.bf16.gmra.mrb[4].mxu1 %v3480_v14  ;;  %v3316_v14 = vld [vmem:[%s4205_s1 + $0xa0] sm:$0xff]  }
  0x57   : > { %2962 = vmatmul.mubr.bf16.gmra.mrb[4].mxu0 %v1459_v50  ;;  %2802 = vmatpush3.bf16.msra.mxu1 %v3311_v13  ;;  %v1084_v13 = vrot.slane %v1082_v39, 2  ;;  %v1091_v50 = vshll.u32 %v3611_v16, 16  ;;  %v2258_v16 = vsel %vm2254_vm5, %v2121_v6, 0.0  ;;  %v2268_v39 = vsel %vm2254_vm5, %v3881_v33, 0.0 }
  0x58   : > { %2982 = vmatpush3.bf16.msra.mxu0 %v3312_v52  ;;  %2785 = vmatprep.mubr.msk.bf16.mxu1 %vm3374_vm0, %v3373_v1  ;;  %v1465_v52 = vsel %vm1252_vm2, %v1462_v9, %v1464_v37  ;;  %v1644_v9 = vshll.u32 %v3674_v43, 16  ;;  %v3867_v43 = vld [vmem:[%s4206_s2 + $0x30] sm:$0xff]  ;;  %v3889_v37 = vld [vmem:[%s4206_s2 + $0x40] sm:$0xff] }
  0x59   : > { %2803 = vmatprep.subr.bf16.mxu1 %v3373_v1  ;;  %2965 = vmatprep.mubr.msk.bf16.mxu0 %vm3374_vm0, %v3373_v1  ;;  %v1093_v57 = vrot.slane %v1091_v50, 2  ;;  %v2266_v36 = vsel %vm2254_vm5, %v3867_v43, 0.0 }
  0x5a   : > { %2983 = vmatprep.subr.bf16.mxu0 %v3373_v1  ;;  %v1646_v32 = vrot.slane %v1644_v9, 3  ;;  %2141 = vperm.xlu1 %3258, %v2121_v6  }
  0x5b   : > { %2804 = vmatpush3.bf16.msra.mxu1 %v3313_v53  ;;  %v1090_v53 = vrot.slane %v1088_v46, 1  ;;  %v1653_v46 = vshll.u32 %v3694_v49, 16 }
  0x5c   : > { %2984 = vmatpush3.bf16.msra.mxu0 %v3315_v55  ;;  %2805 = vmatprep.subr.bf16.mxu1 %v3373_v1  ;;  %v2255_v55 = vsel %vm2254_vm5, %v3813_v41, 0.0 }
  0x5d   : > { %2985 = vmatprep.subr.bf16.mxu0 %v3373_v1 }
  0x5e   : > { %2786 = vmatmul.mubr.bf16.gmra.mrb[8].mxu1 %v3508_v28  ;;  %2146 = vperm.xlu1 %3258, %v3828_v54  }
  0x5f   : > { %2966 = vmatmul.mubr.bf16.gmra.mrb[8].mxu0 %v1461_v0  ;;  %2806 = vmatpush3.bf16.msra.mxu1 %v3316_v14  ;;  %v2256_v14 = vsel %vm2254_vm5, %v2120_v45, 0.0  ;;  %v1638_v0 = vor.u32 %v1637_v42, %v1634_v40  ;;  %v1647_v40 = vor.u32 %v1646_v32, %v1643_v31  ;;  %v1650_v42 = vshrl.u32 %v3694_v49, 16  ;;  %v3905_v45 = vld [vmem:[%s4206_s2 + $0x48] sm:$0xff]  ;;  %v3331_v49 = vld [vmem:[%s4205_s1 + $0xd0] sm:$0xff]  }
  0x60   : > { %2986 = vmatpush3.bf16.msra.mxu0 %v3317_v2  ;;  %2789 = vmatprep.mubr.msk.bf16.mxu1 %vm3374_vm0, %v3373_v1  ;;  %v2257_v63 = vadd.f32 %v2256_v14, %v2255_v55  ;;  %v3846_v2 = vor.u32 %v1084_v13, %v1081_v47  ;;  %v2270_v47 = vsel %vm2254_vm5, %v3889_v37, 0.0  ;;  %v2272_v50 = vsel %vm2254_vm5, %v3905_v45, 0.0 }
  0x61   : > { %2969 = vmatprep.mubr.msk.bf16.mxu0 %vm3374_vm0, %v3373_v1  ;;  %2807 = vmatprep.subr.bf16.mxu1 %v3373_v1  ;;  %v1639_v27 = vsel %vm1622_vm7, %v1630_v58, %v1638_v0  ;;  %v1652_v55 = vrot.slane %v1650_v42, 2  ;;  %v3333_v58 = vld [vmem:[%s4205_s1 + $0xd8] sm:$0xff]   ;;  %v682_v32 = vrot.slane %v3599_v7, 1  ;;  %v3361_v7 = vld [vmem:[%s3462_s18 + $0x8] sm:$0xf] }
  0x62   : > { %2987 = vmatprep.subr.bf16.mxu0 %v3373_v1  ;;  %2151 = vperm.xlu1 %3258, %v3842_v62   ;;  %v1662_v62 = vshll.u32 %v3722_v61, 16 }
  0x63   : > { %2808 = vmatpush3.bf16.msra.mxu1 %v3319_v3  ;;  %v1094_v3 = vor.u32 %v1093_v57, %v1090_v53  ;;  %v3332_v53 = vld [vmem:[%s4205_s1 + $0x210] sm:$0xff]   ;;  %v1655_v57 = vrot.slane %v1653_v46, 3  ;;  %v1990_v46 = vld [vmem:[%s4208_s4] sm:$0x3] }
  0x64   : > { %2988 = vmatpush3.bf16.msra.mxu0 %v3320_v18  ;;  %2809 = vmatprep.subr.bf16.mxu1 %v3373_v1  ;;  %v2259_v18 = vadd.f32 %v2258_v16, %v2257_v63  ;;  %v678_v16 = vrot.slane %v3535_v44, 1  ;;  %v1659_v63 = vshrl.u32 %v3722_v61, 16  ;;  %v1664_v28 = vrot.slane %v1662_v62, 3 }
  0x65   : > { %2989 = vmatprep.subr.bf16.mxu0 %v3373_v1  ;;  %v3860_v21 = vsel %vm1042_vm6, %v3846_v2, %v1094_v3  ;;  %v1656_v59 = vor.u32 %v1655_v57, %v1652_v55  ;;  %v3350_v55 = vld [vmem:[%s4205_s1 + $0x128] sm:$0xff]  }
  0x66   : > { %2790 = vmatmul.mubr.bf16.gmra.mrb[12].mxu1 %v3535_v44  ;;  %v2261_v24 = vadd.f32 %v2260_v8, %v2259_v18  ;;  %v679_v44 = vsel %vm672_vm3, %v676_v48, %v678_v16  ;;  %2156 = vperm.xlu1 %3258, %v3856_v11   ;;  %v3336_v8 = vld [vmem:[%s4205_s1 + $0x220] sm:$0xff]   ;;  %v1661_v9 = vrot.slane %v1659_v63, 2  ;;  %v3956_v18 = vld [vmem:[%s3462_s18 + $0x30] ss:$0 sps:$4 sm:$0x77]   ;;  %v680_v48 = vrot.slane %v3571_v60, 1 }
  0x67   : > { %2970 = vmatmul.mubr.bf16.gmra.mrb[12].mxu0 %v1463_v25  ;;  %2793 = vmatprep.mubr.msk.bf16.mxu1 %vm3374_vm0, %v3373_v1  ;;  %v3327_v25 = vld [vmem:[%s4205_s1 + $0xc0] sm:$0xff]   ;;  %v1657_v3 = vsel %vm1622_vm7, %v1647_v40, %v1656_v59 }
  0x68   : > { %2810 = vmatpush3.bf16.msra.mxu1 %v3321_v26  ;;  %2973 = vmatprep.mubr.msk.bf16.mxu0 %vm3374_vm0, %v3373_v1  ;;  %v2264_v26 = vsel %vm2254_vm5, %v3856_v11, 0.0  ;;  %v3337_v11 = vld [vmem:[%s4205_s1 + $0xe8] sm:$0xff]  }
  0x69   : > { %2990 = vmatpush3.bf16.msra.mxu0 %v3322_v30  ;;  %2811 = vmatprep.subr.bf16.mxu1 %v3373_v1  ;;  %v3328_v30 = vld [vmem:[%s4205_s1 + $0x200] sm:$0xff]  }
  0x6a   : > { %2991 = vmatprep.subr.bf16.mxu0 %v3373_v1  ;;  %2161 = vperm.xlu1 %3258, %v3867_v43   ;;  %v3340_v43 = vld [vmem:[%s4205_s1 + $0x230] sm:$0xff]  }
  0x6c   : > { %2812 = vmatpush3.bf16.msra.mxu1 %v3324_v35  ;;  %v2263_v35 = vadd.f32 %v2262_v22, %v2261_v24  ;;  %v1665_v22 = vor.u32 %v1664_v28, %v1661_v9  ;;  %v1668_v24 = vshrl.u32 %v3956_v18, 16  ;;  %v3364_v9 = vld [vmem:[%s3462_s18 + $0x1c] sm:$0xff]  }
  0x6d   : > { %2992 = vmatpush3.bf16.msra.mxu0 %v3325_v38  ;;  %2833 = vmatprep.subr.bf16.mxu1 %v3373_v1  ;;  %v1070_v28 = vshrl.u32 %v3364_v9, 16 }
  0x6e   : > { %2794 = vmatmul.mubr.bf16.gmra.mrb[16].mxu1 %v3571_v60  ;;  %3013 = vmatprep.subr.bf16.mxu0 %v3373_v1  ;;  %v2265_v38 = vadd.f32 %v2264_v26, %v2263_v35  ;;  %v681_v60 = vsel %vm672_vm3, %v678_v16, %v680_v48  ;;  %v1666_v26 = vsel %vm1622_vm7, %v1656_v59, %v1665_v22  ;;  %v820_v35 = vld [vmem:[%s3462_s18 + $0x4] sm:$0xe] }
  0x6f   : > { %2974 = vmatmul.mubr.bf16.gmra.mrb[16].mxu0 %v1465_v52  ;;  %2813 = vmatprep.mubr.msk.bf16.mxu1 %vm3374_vm0, %v3373_v1  ;;  %v1648_v52 = vsel %vm1622_vm7, %v1638_v0, %v1647_v40  ;;  %v3335_v0 = vld [vmem:[%s4205_s1 + $0xe0] sm:$0xff]   ;;  %v3362_v40 = vld [vmem:[%s3462_s18 + $0xc] sm:$0xff]  }
  0x70   : > { %2993 = vmatprep.mubr.msk.bf16.mxu0 %vm3374_vm0, %v3373_v1  ;;  %v2267_v6 = vadd.f32 %v2266_v36, %v2265_v38  ;;  %2166 = vperm.xlu1 %3258, %v3881_v33   ;;  %v3342_v38 = vld [vmem:[%s4205_s1 + $0xf8] sm:$0xff]   ;;  %v876_v42 = vrot.slane %v3362_v40, 1  ;;  %v1052_v57 = vshrl.u32 %v3362_v40, 16 }
  0x71   : > { %v3343_v33 = vld [vmem:[%s4205_s1 + $0x238] sm:$0xff]  }
  0x72   : > { %v2269_v13 = vadd.f32 %v2268_v39, %v2267_v6  ;;  %v683_v39 = vsel %vm672_vm3, %v680_v48, %v682_v32 }
  0x74   : > { %v2271_v54 = vadd.f32 %v2270_v47, %v2269_v13  ;;  %2171 = vperm.xlu1 %3258, %v3889_v37   ;;  %v3345_v47 = vld [vmem:[%s4205_s1 + $0x100] sm:$0xff]   ;;  %v2034_v13 = vsel %vm2032_vm8, %v1990_v46, 0 }
  0x76   : > { %2814 = vmatmul.mubr.bf16.vlgmr.msra.gmra.mrb[0].mxu1 %v3670_v12  ;;  %v3330_v12 = vld [vmem:[%s4205_s1 + $0x208] sm:$0xff]   ;;  %v2273_v14 = vadd.f32 %v2272_v50, %v2271_v54  ;;  %v1055_v54 = vshll.u32 %v3362_v40, 16 }
  0x77   : > { %2994 = vmatmul.mubr.bf16.vlgmr.msra.gmra.mrb[0].mxu0 %v1639_v27  ;;  %2834 = vmatpush3.bf16.msra.mxu1 %v3327_v25  ;;  %v1671_v25 = vshll.u32 %v3956_v18, 16  ;;  %v3339_v27 = vld [vmem:[%s4205_s1 + $0xf0] sm:$0xff]  }
  0x78   : > { %3014 = vmatpush3.bf16.msra.mxu0 %v3328_v30  ;;  %2835 = vmatprep.subr.bf16.mxu1 %v3373_v1  ;;  %v1670_v30 = vrot.slane %v1668_v24, 2  ;;  %v1057_v59 = vrot.slane %v1055_v54, 2 }
  0x79   : > { %3015 = vmatprep.subr.bf16.mxu0 %v3373_v1  ;;  %2817 = vmatprep.mubr.msk.bf16.mxu1 %vm3374_vm0, %v3373_v1  ;;  %v1673_v31 = vrot.slane %v1671_v25, 3 }
  0x7a   : > { %2997 = vmatprep.mubr.msk.bf16.mxu0 %vm3374_vm0, %v3373_v1  ;;  %2274 = vadd.xlane.f32.xlu0 %v2273_v14  ;;  %v1842_v14 = vrot.slane %v3956_v18, 3  ;;  %v1073_v18 = vshll.u32 %v3364_v9, 16 }
  0x7b   : > { %2836 = vmatpush3.bf16.msra.mxu1 %v3329_v34  ;;  %v1674_v36 = vor.u32 %v1673_v31, %v1670_v30  ;;  %v4002_v34 = vcombine.low %v820_v35, %v3361_v7  ;;  %2176 = vperm.xlu1 %3258, %v3905_v45   ;;  %v3363_v45 = vld [vmem:[%s3462_s18 + $0x14] sm:$0xff]   ;;  %v3358_v30 = vld [vmem:[%s3786_s11 + $0x20] sm:$0xff]  }
  0x7c   : > { %3016 = vmatpush3.bf16.msra.mxu0 %v3330_v12  ;;  %2837 = vmatprep.subr.bf16.mxu1 %v3373_v1 }
  0x7d   : > { %3017 = vmatprep.subr.bf16.mxu0 %v3373_v1  ;;  %v1675_v12 = vsel %vm1622_vm7, %v1665_v22, %v1674_v36  ;;  %v875_v37 = vrot.slane %v4002_v34, 1  ;;  %v1072_v22 = vrot.slane %v1070_v28, 1 }
  0x7e   : > { %2818 = vmatmul.mubr.bf16.gmra.mrb[4].mxu1 %v3556_v51  ;;  %v3334_v51 = vld [vmem:[%s4205_s1 + $0x218] sm:$0xff]  }
  0x7f   : > { %2998 = vmatmul.mubr.bf16.gmra.mrb[4].mxu0 %v1648_v52  ;;  %2838 = vmatpush3.bf16.msra.mxu1 %v3331_v49  ;;  %v877_v6 = vsel %vm672_vm3, %v875_v37, %v876_v42  ;;  %v878_v49 = vrot.slane %v3363_v45, 1  ;;  %v3348_v52 = vld [vmem:[%s4205_s1 + $0x118] sm:$0xff]  }
  0x80   : > { %3018 = vmatpush3.bf16.msra.mxu0 %v3332_v53  ;;  %2821 = vmatprep.mubr.msk.bf16.mxu1 %vm3374_vm0, %v3373_v1 }
  0x81   : > { %2839 = vmatprep.subr.bf16.mxu1 %v3373_v1  ;;  %3001 = vmatprep.mubr.msk.bf16.mxu0 %vm3374_vm0, %v3373_v1  ;;  %v879_v50 = vsel %vm672_vm3, %v876_v42, %v878_v49  ;;  %v881_v53 = vsel %vm672_vm3, %v878_v49, %v880_v10  ;;  %v1044_v10 = vshrl.u32 %v4002_v34, 16 }
  0x82   : > { %3019 = vmatprep.subr.bf16.mxu0 %v3373_v1 }
  0x83   : > { %2840 = vmatpush3.bf16.msra.mxu1 %v3333_v58  ;;  %v1054_v58 = vrot.slane %v1052_v57, 1 }
  0x84   : > { %3020 = vmatpush3.bf16.msra.mxu0 %v3334_v51  ;;  %2841 = vmatprep.subr.bf16.mxu1 %v3373_v1  ;;  %v1843_v51 = vsel %vm1832_vm4, %v1840_v15, %v1842_v14 }
  0x85   : > { %3021 = vmatprep.subr.bf16.mxu0 %v3373_v1  ;;  %v1058_v62 = vor.u32 %v1057_v59, %v1054_v58 }
  0x86   : > { %2822 = vmatmul.mubr.bf16.gmra.mrb[8].mxu1 %v679_v44  ;;  %v1061_v44 = vshrl.u32 %v3363_v45, 16 }
  0x87   : > { %3002 = vmatmul.mubr.bf16.gmra.mrb[8].mxu0 %v1657_v3  ;;  %2842 = vmatpush3.bf16.msra.mxu1 %v3335_v0  ;;  %v1064_v0 = vshll.u32 %v3363_v45, 16  ;;  %v3354_v3 = vld [vmem:[%s3786_s11] sm:$0xff]  }
  0x88   : > { %3022 = vmatpush3.bf16.msra.mxu0 %v3336_v8  ;;  %2825 = vmatprep.mubr.msk.bf16.mxu1 %vm3374_vm0, %v3373_v1  ;;  %v1063_v15 = vrot.slane %v1061_v44, 1 }
  0x89   : > { %3005 = vmatprep.mubr.msk.bf16.mxu0 %vm3374_vm0, %v3373_v1  ;;  %2843 = vmatprep.subr.bf16.mxu1 %v3373_v1  ;;  %v1066_v8 = vrot.slane %v1064_v0, 2 }
  0x8a   : > { %3023 = vmatprep.subr.bf16.mxu0 %v3373_v1 }
  0x8b   : > { %2844 = vmatpush3.bf16.msra.mxu1 %v3337_v11  ;;  %v3355_v11 = vld [vmem:[%s3786_s11 + $0x8] sm:$0xff]  }
  0x8c   : > { %3024 = vmatpush3.bf16.msra.mxu0 %v3338_v23  ;;  %2845 = vmatprep.subr.bf16.mxu1 %v3373_v1  ;;  %v1075_v23 = vrot.slane %v1073_v18, 2 }
  0x8d   : > { %3025 = vmatprep.subr.bf16.mxu0 %v3373_v1 }
  0x8e   : > { %2826 = vmatmul.mubr.bf16.gmra.mrb[12].mxu1 %v681_v60  ;;  %v1076_v24 = vor.u32 %v1075_v23, %v1072_v22  ;;  %v3356_v60 = vld [vmem:[%s3786_s11 + $0x10] sm:$0xff]  }
  0x8f   : > { %3006 = vmatmul.mubr.bf16.gmra.mrb[12].mxu0 %v1666_v26  ;;  %2829 = vmatprep.mubr.msk.bf16.mxu1 %vm3374_vm0, %v3373_v1 }
  0x90   : > { %2846 = vmatpush3.bf16.msra.mxu1 %v3339_v27  ;;  %3009 = vmatprep.mubr.msk.bf16.mxu0 %vm3374_vm0, %v3373_v1  ;;  %v1086_v26 = vsel %vm1042_vm6, %v1076_v24, %v3846_v2  ;;  %v3357_v27 = vld [vmem:[%s3786_s11 + $0x18] sm:$0xff]  }
  0x91   : > { %3026 = vmatpush3.bf16.msra.mxu0 %v3340_v43  ;;  %2847 = vmatprep.subr.bf16.mxu1 %v3373_v1 }
  0x92   : > { %3027 = vmatprep.subr.bf16.mxu0 %v3373_v1  ;;  %2131 = vperm.xlu0 %3257, %v3813_v41   ;;  %v3346_v41 = vld [vmem:[%s4205_s1 + $0x108] sm:$0xff]  }
  0x94   : > { %2848 = vmatpush3.bf16.msra.mxu1 %v3342_v38 }
  0x95   : > { %3028 = vmatpush3.bf16.msra.mxu0 %v3343_v33  ;;  %2869 = vmatprep.subr.bf16.mxu1 %v3373_v1 }
  0x96   : > { %2830 = vmatmul.mubr.bf16.gmra.mrb[16].mxu1 %v683_v39  ;;  %3049 = vmatprep.subr.bf16.mxu0 %v3373_v1 }
  0x97   : > { %3010 = vmatmul.mubr.bf16.gmra.mrb[16].mxu0 %v1675_v12  ;;  %2849 = vmatprep.mubr.msk.bf16.mxu1 %vm3374_vm0, %v3373_v1 }
  0x98   : > { %3029 = vmatprep.mubr.msk.bf16.mxu0 %vm3374_vm0, %v3373_v1 }
  0x9e   : > { %2850 = vmatmul.mubr.bf16.vlgmr.msra.gmra.mrb[0].mxu1 %v877_v6 }
  0x9f   : > { %3030 = vmatmul.mubr.bf16.vlgmr.msra.gmra.mrb[0].mxu0 %v3735_v4  ;;  %2870 = vmatpush3.bf16.msra.mxu1 %v3345_v47  ;;  %v3347_v4 = vld [vmem:[%s4205_s1 + $0x110] sm:$0xff]  }
  0xa0   : > { %3050 = vmatpush3.bf16.msra.mxu0 %v2034_v13  ;;  %2871 = vmatprep.subr.bf16.mxu1 %v3373_v1 }
  0xa1   : > { %2853 = vmatprep.mubr.msk.bf16.mxu1 %vm3374_vm0, %v3373_v1  ;;  %3033 = vmatprep.mubr.msk.bf16.mxu0 %vm3374_vm0, %v3373_v1 }
  0xa3   : > { %2872 = vmatpush3.bf16.msra.mxu1 %v3346_v41 }
  0xa4   : > { %2873 = vmatprep.subr.bf16.mxu1 %v3373_v1 }
  0xa6   : > { %2854 = vmatmul.mubr.bf16.gmra.mrb[4].mxu1 %v879_v50 }
  0xa7   : > { %3034 = vmatmul.mubr.bf16.gmra.mrb[4].mxu0 %v3738_v5  ;;  %2874 = vmatpush3.bf16.msra.mxu1 %v3347_v4  ;;  %v3349_v5 = vld [vmem:[%s4205_s1 + $0x120] sm:$0xff]  }
  0xa8   : > { %2857 = vmatprep.mubr.msk.bf16.mxu1 %vm3374_vm0, %v3373_v1  ;;  %2875 = vmatprep.subr.bf16.mxu1 %v3373_v1 }
  0xa9   : > { %3037 = vmatprep.mubr.msk.bf16.mxu0 %vm3374_vm0, %v3373_v1 }
  0xab   : > { %2876 = vmatpush3.bf16.msra.mxu1 %v3348_v52 }
  0xac   : > { %2877 = vmatprep.subr.bf16.mxu1 %v3373_v1 }
  0xae   : > { %2858 = vmatmul.mubr.bf16.gmra.mrb[8].mxu1 %v881_v53 }
  0xaf   : > { %3038 = vmatmul.mubr.bf16.gmra.mrb[8].mxu0 %v3747_v17  ;;  %2878 = vmatpush3.bf16.msra.mxu1 %v3349_v5  ;;  %v1047_v17 = vshll.u32 %v4002_v34, 16 }
  0xb0   : > { %2861 = vmatprep.mubr.msk.bf16.mxu1 %vm3374_vm0, %v3373_v1  ;;  %3041 = vmatprep.mubr.msk.bf16.mxu0 %vm3374_vm0, %v3373_v1 }
  0xb1   : > { %2879 = vmatprep.subr.bf16.mxu1 %v3373_v1  ;;  %v1049_v16 = vrot.slane %v1047_v17, 2 }
  0xb3   : > { %2880 = vmatpush3.bf16.msra.mxu1 %v3350_v55 }
  0xb4   : > { %2881 = vmatprep.subr.bf16.mxu1 %v3373_v1 }
  0xb6   : > { %2862 = vmatmul.mubr.bf16.gmra.mrb[12].mxu1 %v3757_v19  ;;  %v3353_v19 = vld [vmem:[%s4205_s1 + $0x138] sm:$0xff]  }
  0xb7   : > { %3042 = vmatmul.mubr.bf16.gmra.mrb[12].mxu0 %v3762_v20  ;;  %2865 = vmatprep.mubr.msk.bf16.mxu1 %vm3374_vm0, %v3373_v1  ;;  %v1046_v20 = vrot.slane %v1044_v10, 1 }
  0xb8   : > { %2882 = vmatpush3.bf16.msra.mxu1 %v3351_v56  ;;  %3045 = vmatprep.mubr.msk.bf16.mxu0 %vm3374_vm0, %v3373_v1 }
  0xb9   : > { %2883 = vmatprep.subr.bf16.mxu1 %v3373_v1  ;;  %v1050_v63 = vor.u32 %v1049_v16, %v1046_v20 }
  0xbb   : > { %v1059_v61 = vsel %vm1042_vm6, %v1050_v63, %v1058_v62 }
  0xbc   : > { %2884 = vmatpush3.bf16.msra.mxu1 %v3353_v19 }
  0xbe   : > { %2866 = vmatmul.mubr.bf16.gmra.mrb[16].mxu1 %v3779_v29  ;;  %v1067_v29 = vor.u32 %v1066_v8, %v1063_v15 }
  0xbf   : > { %3046 = vmatmul.mubr.bf16.gmra.mrb[16].mxu0 %v1843_v51  ;;  %2885 = vmatprep.mubr.msk.bf16.mxu1 %vm3374_vm0, %v3373_v1 }
  0xc0   : > { %3051 = vmatprep.mubr.msk.bf16.mxu0 %vm3374_vm0, %v3373_v1  ;;  %v1068_v48 = vsel %vm1042_vm6, %v1058_v62, %v1067_v29  ;;  %v1077_v25 = vsel %vm1042_vm6, %v1067_v29, %v1076_v24 }
  0xc6   : > { %2886 = vmatmul.mubr.bf16.vlgmr.msra.gmra.mrb[0].mxu1 %v1059_v61 }
  0xc7   : > { %3052 = vmatmul.mubr.msk.bf16.vlgmr.msra.gmra.mrb[0].mxu0 %vm2016_vm9, %v3354_v3  ;;  %2889 = vmatprep.mubr.msk.bf16.mxu1 %vm3374_vm0, %v3373_v1 }
  0xc8   : > { %3055 = vmatprep.mubr.msk.bf16.mxu0 %vm3374_vm0, %v3373_v1 }
  0xce   : > { %2890 = vmatmul.mubr.bf16.gmra.mrb[4].mxu1 %v1068_v48 }
  0xcf   : > { %3056 = vmatmul.mubr.msk.bf16.gmra.mrb[4].mxu0 %vm2016_vm9, %v3355_v11  ;;  %2893 = vmatprep.mubr.msk.bf16.mxu1 %vm3374_vm0, %v3373_v1 }
  0xd0   : > { %3059 = vmatprep.mubr.msk.bf16.mxu0 %vm3374_vm0, %v3373_v1 }
  0xd4   : > { %v4121_v33 = vpop.permute.xlu1 %2136 }
  0xd6   : > { %2894 = vmatmul.mubr.bf16.gmra.mrb[8].mxu1 %v1077_v25 }
  0xd7   : > { %3060 = vmatmul.mubr.msk.bf16.gmra.mrb[8].mxu0 %vm2016_vm9, %v3356_v60  ;;  %2897 = vmatprep.mubr.msk.bf16.mxu1 %vm3374_vm0, %v3373_v1 }
  0xd8   : > { %3063 = vmatprep.mubr.msk.bf16.mxu0 %vm3374_vm0, %v3373_v1 }
  0xd9   : > { %v4123_v7 = vpop.permute.xlu1 %2141 }
  0xdd   : > { %v4125_v34 = vpop.permute.xlu1 %2146 }
  0xde   : > { %2898 = vmatmul.mubr.bf16.gmra.mrb[12].mxu1 %v1086_v26 }
  0xdf   : > { %3064 = vmatmul.mubr.msk.bf16.gmra.mrb[12].mxu0 %vm2016_vm9, %v3357_v27  ;;  %2901 = vmatprep.mubr.msk.bf16.mxu1 %vm3374_vm0, %v3373_v1 }
  0xe0   : > { %3067 = vmatprep.mubr.msk.bf16.mxu0 %vm3374_vm0, %v3373_v1 }
  0xe1   : > { %v4127_v1 = vpop.permute.xlu1 %2151 }
  0xe5   : > { %v4146_v50 = vpop.permute.xlu1 %2156 }
  0xe6   : > { %2902 = vmatmul.mubr.bf16.gmra.mrb[16].mxu1 %v3860_v21 }
  0xe7   : > { %3068 = vmatmul.mubr.msk.bf16.gmra.mrb[16].mxu0 %vm2016_vm9, %v3358_v30 }
  0xe9   : > { %v4157_v59 = vpop.permute.xlu1 %2161 }
  0xef   : > { %v4168_v22 = vpop.permute.xlu1 %2166 }
 0x107   : > { %v2275_v31 = vpop.xlane.xlu0 %2274 }
 0x108   : > { %v2276_v43 = vrot.slane %v2275_v31, 4 }
 0x10a   : > { %v2277_v32 = vadd.f32 %v2276_v43, %v2275_v31 }
 0x10c   : > { %v2278_v35 = vrot.slane %v2277_v32, 2 }
 0x10e   : > { %v2279_v2 = vadd.f32 %v2278_v35, %v2277_v32 }
 0x110   : > { %v2280_v36 = vrot.slane %v2279_v2, 1 }
 0x111   : > { %v4129_v39 = vpop.permute.xlu0 %2131 }
 0x112   : > { %v2281_v38 = vadd.f32 %v2280_v36, %v2279_v2 }
 0x114   : > { %3243 = vpush %v2281_v38 }
 0x145   : > { %s3244_s30 = spop %3243 }
 0x146   : > { %s2283_s14 = smax.f32 %s3376_s13, %s3244_s30 }
 0x199   : > { %v1183_v21 = vpop.f32.mrb[0].mxu1 }
 0x19a   : > { %v2070_v12 = vpop.f32.mrb[0].mxu0  ;;  %v2887_v37 = vpop.f32.mrb[1].mxu1 }
 0x19b   : > { %v4131_v40 = vadd.f32 %v2070_v12, %v1183_v21  ;;  %v3053_v42 = vpop.f32.mrb[1].mxu0  ;;  %v1186_v46 = vpop.f32.mrb[2].mxu1 }
 0x19c   : > { %v2073_v6 = vpop.f32.mrb[2].mxu0  ;;  %v2888_v47 = vpop.f32.mrb[3].mxu1 }
 0x19d   : > { %v4133_v13 = vadd.f32 %v2073_v6, %v1186_v46  ;;  %v3054_v41 = vpop.f32.mrb[3].mxu0  ;;  %v2179_v45 = vmul.f32 %v4131_v40, %v4129_v39  ;;  %v2172_v12 = vpop.permute.xlu1 %2171 }
 0x19f   : > { %v2180_v49 = vmul.f32 %v4133_v13, %v4121_v33 }
 0x1a1   : > { %v2576_v4 = vpack.c.bf16 %v2180_v49, %v2179_v45  ;;  %v2239_v52 = vadd.f32 %v2180_v49, %v2179_v45  ;;  %v1191_v53 = vpop.f32.mrb[4].mxu1 }
 0x1a2   : > { %v2078_v5 = vpop.f32.mrb[4].mxu0  ;;  %v2891_v55 = vpop.f32.mrb[5].mxu1 }
 0x1a3   : > { %2577 = vst [vmem:[%s4144_s12] sm:$0xff] %v2576_v4   ;;  %v4149_v56 = vadd.f32 %v2078_v5, %v1191_v53  ;;  %v3057_v10 = vpop.f32.mrb[5].mxu0  ;;  %v1194_v17 = vpop.f32.mrb[6].mxu1 }
 0x1a4   : > { %v2081_v57 = vpop.f32.mrb[6].mxu0  ;;  %v2892_v54 = vpop.f32.mrb[7].mxu1 }
 0x1a5   : > { %v2181_v14 = vmul.f32 %v4149_v56, %v4123_v7  ;;  %v4153_v19 = vadd.f32 %v2081_v57, %v1194_v17  ;;  %v3058_v20 = vpop.f32.mrb[7].mxu0  ;;  %v2177_v10 = vpop.permute.xlu1 %2176 }
 0x1a6   : > { %v2284_v20 = vstv %s2283_s14 }
 0x1a7   : > { %v2240_v16 = vadd.f32 %v2239_v52, %v2181_v14  ;;  %v2182_v58 = vmul.f32 %v4153_v19, %v4125_v34  ;;  %3359 = vrcp.f32 %v2284_v20 }
 0x1a9   : > { %v2581_v51 = vpack.c.bf16 %v2182_v58, %v2181_v14  ;;  %v2241_v63 = vadd.f32 %v2240_v16, %v2182_v58  ;;  %v1199_v62 = vpop.f32.mrb[8].mxu1 }
 0x1aa   : > { %v2086_v44 = vpop.f32.mrb[8].mxu0  ;;  %v2895_v0 = vpop.f32.mrb[9].mxu1 }
 0x1ab   : > { %2598 = vst [vmem:[%s4144_s12 + $0x8] sm:$0xff] %v2581_v51   ;;  %v4160_v61 = vadd.f32 %v2086_v44, %v1199_v62  ;;  %v3061_v3 = vpop.f32.mrb[9].mxu0  ;;  %v1202_v15 = vpop.f32.mrb[10].mxu1 }
 0x1ac   : > { %v2089_v8 = vpop.f32.mrb[10].mxu0  ;;  %v2896_v29 = vpop.f32.mrb[11].mxu1 }
 0x1ad   : > { %v2183_v9 = vmul.f32 %v4160_v61, %v4127_v1  ;;  %v4164_v28 = vadd.f32 %v2089_v8, %v1202_v15  ;;  %v3062_v18 = vpop.f32.mrb[11].mxu0 }
 0x1af   : > { %v2242_v48 = vadd.f32 %v2241_v63, %v2183_v9  ;;  %v2184_v11 = vmul.f32 %v4164_v28, %v4146_v50 }
 0x1b1   : > { %v2586_v23 = vpack.c.bf16 %v2184_v11, %v2183_v9  ;;  %v2243_v24 = vadd.f32 %v2242_v48, %v2184_v11  ;;  %v1207_v25 = vpop.f32.mrb[12].mxu1  ;;  %v3360_v0 = vpop.eup %3359 }
 0x1b2   : > { %v2094_v60 = vpop.f32.mrb[12].mxu0  ;;  %v2899_v26 = vpop.f32.mrb[13].mxu1 }
 0x1b3   : > { %2599 = vst [vmem:[%s4144_s12 + $0x10] sm:$0xff] %v2586_v23   ;;  %v4171_v27 = vadd.f32 %v2094_v60, %v1207_v25  ;;  %v3065_v30 = vpop.f32.mrb[13].mxu0  ;;  %v1210_v31 = vpop.f32.mrb[14].mxu1 }
 0x1b4   : > { %v2097_v43 = vpop.f32.mrb[14].mxu0  ;;  %v2900_v32 = vpop.f32.mrb[15].mxu1 }
 0x1b5   : > { %v2185_v35 = vmul.f32 %v4171_v27, %v4157_v59  ;;  %v4175_v2 = vadd.f32 %v2097_v43, %v1210_v31  ;;  %v3066_v36 = vpop.f32.mrb[15].mxu0 }
 0x1b7   : > { %v2244_v38 = vadd.f32 %v2243_v24, %v2185_v35  ;;  %v2186_v21 = vmul.f32 %v4175_v2, %v4168_v22 }
 0x1b9   : > { %v2591_v37 = vpack.c.bf16 %v2186_v21, %v2185_v35  ;;  %v2245_v42 = vadd.f32 %v2244_v38, %v2186_v21  ;;  %v1215_v46 = vpop.f32.mrb[16].mxu1 }
 0x1ba   : > { %v2102_v6 = vpop.f32.mrb[16].mxu0  ;;  %v2903_v47 = vpop.f32.mrb[17].mxu1 }
 0x1bb   : > { %2600 = vst [vmem:[%s4144_s12 + $0x18] sm:$0xff] %v2591_v37   ;;  %v3079_v41 = vadd.f32 %v2102_v6, %v1215_v46  ;;  %v3069_v45 = vpop.f32.mrb[17].mxu0  ;;  %v1218_v49 = vpop.f32.mrb[18].mxu1 }
 0x1bc   : > { %v2105_v4 = vpop.f32.mrb[18].mxu0  ;;  %v2904_v52 = vpop.f32.mrb[19].mxu1 }
 0x1bd   : > { %v2187_v53 = vmul.f32 %v3079_v41, %v2172_v12  ;;  %v3080_v5 = vadd.f32 %v2105_v4, %v1218_v49  ;;  %v3070_v55 = vpop.f32.mrb[19].mxu0 }
 0x1bf   : > { %v2246_v17 = vadd.f32 %v2245_v42, %v2187_v53  ;;  %v2188_v57 = vmul.f32 %v3080_v5, %v2177_v10 }
 0x1c1   : > { %v2596_v54 = vpack.c.bf16 %v2188_v57, %v2187_v53  ;;  %v2247_v14 = vadd.f32 %v2246_v17, %v2188_v57 }
 0x1c3   : > { %2601 = vst [vmem:[%s4144_s12 + $0x20] sm:$0xff] %v2596_v54   ;;  %v2248_v16 = vrot.slane %v2247_v14, 4 }
 0x1c5   : > { %v2249_v58 = vadd.f32 %v2248_v16, %v2247_v14 }
 0x1c7   : > { %v2250_v51 = vrot.slane %v2249_v58, 2 }
 0x1c9   : > { %v2251_v63 = vadd.f32 %v2250_v51, %v2249_v58 }
 0x1cb   : > { %v2252_v62 = vrot.slane %v2251_v63, 1 }
 0x1cd   : > { %v2253_v44 = vadd.f32 %v2252_v62, %v2251_v63 }
 0x1cf   : > { %v2286_v3 = vmul.f32 %v3360_v0, %v2253_v44 }
 0x1d1   : > { %v2287_v15 = vsub.f32 %v4131_v40, %v2286_v3  ;;  %v2288_v8 = vsub.f32 %v4133_v13, %v2286_v3  ;;  %v2289_v29 = vsub.f32 %v4149_v56, %v2286_v3  ;;  %v2290_v9 = vsub.f32 %v4153_v19, %v2286_v3 }
 0x1d2   : > { %v2291_v18 = vsub.f32 %v4160_v61, %v2286_v3  ;;  %v2292_v48 = vsub.f32 %v4164_v28, %v2286_v3  ;;  %v2293_v11 = vsub.f32 %v4171_v27, %v2286_v3  ;;  %v2294_v23 = vsub.f32 %v4175_v2, %v2286_v3 }
 0x1d3   : > { %v2295_v24 = vsub.f32 %v3079_v41, %v2286_v3  ;;  %v2296_v25 = vsub.f32 %v3080_v5, %v2286_v3  ;;  %v2297_v60 = vmul.f32 %v2287_v15, %v4129_v39  ;;  %v2298_v40 = vmul.f32 %v2288_v8, %v4121_v33 }
 0x1d4   : > { %v2299_v13 = vmul.f32 %v2289_v29, %v4123_v7  ;;  %v2300_v56 = vmul.f32 %v2290_v9, %v4125_v34  ;;  %v2301_v61 = vmul.f32 %v2291_v18, %v4127_v1  ;;  %v2302_v27 = vmul.f32 %v2292_v48, %v4146_v50 }
 0x1d5   : > { %v2307_v26 = vmul.f32 %v2297_v60, %v2297_v60  ;;  %v2308_v19 = vmul.f32 %v2298_v40, %v2298_v40  ;;  %v2303_v32 = vmul.f32 %v2293_v11, %v4157_v59  ;;  %v2304_v33 = vmul.f32 %v2294_v23, %v4168_v22 }
 0x1d6   : > { %v2309_v30 = vmul.f32 %v2299_v13, %v2299_v13  ;;  %v2310_v31 = vmul.f32 %v2300_v56, %v2300_v56  ;;  %v2311_v35 = vmul.f32 %v2301_v61, %v2301_v61  ;;  %v2312_v2 = vmul.f32 %v2302_v27, %v2302_v27 }
 0x1d7   : > { %v2317_v28 = vadd.f32 %v2308_v19, %v2307_v26  ;;  %v2305_v36 = vmul.f32 %v2295_v24, %v2172_v12  ;;  %v2313_v34 = vmul.f32 %v2303_v32, %v2303_v32  ;;  %v2306_v21 = vmul.f32 %v2296_v25, %v2177_v10 }
 0x1d8   : > { %v2314_v1 = vmul.f32 %v2304_v33, %v2304_v33  ;;  %v2332_v59 = vlaneseq }
 0x1d9   : > { %v2318_v43 = vadd.f32 %v2317_v28, %v2309_v30  ;;  %v2315_v42 = vmul.f32 %v2305_v36, %v2305_v36  ;;  %v2316_v50 = vmul.f32 %v2306_v21, %v2306_v21 }
 0x1da   : > { %v2333_v4 = vshrl.u32 %v2332_v59, 7 }
 0x1db   : > { %v2319_v39 = vadd.f32 %v2318_v43, %v2310_v31 }
 0x1dc   : > { %vm2335_vm10 = vcmp.eq.s32.totalorder %v2333_v4, 1  ;;  %vm2334_vm11 = vcmp.eq.s32.totalorder %v2333_v4, 0 }
 0x1dd   : > { %v2320_v7 = vadd.f32 %v2319_v39, %v2311_v35 }
 0x1df   : > { %v2321_v38 = vadd.f32 %v2320_v7, %v2312_v2 }
 0x1e1   : > { %v2322_v37 = vadd.f32 %v2321_v38, %v2313_v34 }
 0x1e3   : > { %v2323_v46 = vadd.f32 %v2322_v37, %v2314_v1 }
 0x1e5   : > { %v2324_v6 = vadd.f32 %v2323_v46, %v2315_v42 }
 0x1e7   : > { %v2325_v47 = vadd.f32 %v2324_v6, %v2316_v50 }
 0x1e9   : > { %v2326_v41 = vrot.slane %v2325_v47, 4 }
 0x1eb   : > { %v2327_v45 = vadd.f32 %v2326_v41, %v2325_v47 }
 0x1ed   : > { %v2328_v49 = vrot.slane %v2327_v45, 2 }
 0x1ef   : > { %v2329_v22 = vadd.f32 %v2328_v49, %v2327_v45 }
 0x1f1   : > { %v2330_v52 = vrot.slane %v2329_v22, 1 }
 0x1f3   : > { %v2331_v12 = vadd.f32 %v2330_v52, %v2329_v22 }
 0x1f5   : > { %v2336_v53 = vsel %vm2335_vm10, %v2331_v12, 0.0 }
 0x1f6   : > { %v2337_v5 = vsel %vm2334_vm11, %v2253_v44, %v2336_v53 }
 0x1f7   : > { %2338 = vst [vmem:[%s282_s19] sm:$0xff] %v2337_v5 }
 0x1f8 PF: > { %s17_s21 = sadd.s32 1, %s3371_s21  }
 0x1f9   : > { %p14_p4 = scmp.ge.s32.totalorder %s17_s21, 4  }
 0x1fb   :  { %16 = sbr.rel (!%p14_p4) target bundleno = 1 (0x1), region = 85 }

</bundles_post_ra>
